<compile_context>
chip_gen: v6e
topology: v6e:2x2x1
jax: 0.10.0
libtpu: 0.0.40
codegen_flags: <defaults>
</compile_context>

<pallas_src>
import math
from functools import partial

import jax
import jax.numpy as jnp
import numpy as np
from jax.experimental import pallas as pl
from jax.experimental.pallas import tpu as pltpu

NEG_SLOPE = 0.01  # F.leaky_relu default
LANES = 128


def _round_up(v, m):
    return (v + m - 1) // m * m


def _leaky_relu(y):
    return jnp.where(y > 0, y, NEG_SLOPE * y)


# ----------------------------------------------------------------------------
# Fused Pallas kernel (whole BasicBlock for one image)
# ----------------------------------------------------------------------------
def _basicblock_kernel(xph_ref, w1_ref, b1_ref, w2_ref, b2_ref, o_ref, h1p_ref, *,
                       stride, Ho, Wo, pool_mode):
    """conv1(3x3, stride)+bn1+leaky_relu -> conv2(3x3,1)+bn2 -> +shortcut -> leaky_relu.

    xph_ref : (1, s*s, Hq, Wq, C) bf16   phase-split, spatially padded input
    w1_ref  : (9, C, C)           bf16   (kh*3+kw, cin, cout), BN1 scale folded in
    b1_ref  : (1, C)              f32    folded BN1 bias
    w2_ref  : (9, C, C)           bf16   BN2 scale folded in
    b2_ref  : (1, C)              f32    folded BN2 bias
    o_ref   : (1, Ho*Wo, C)       f32    block output
    h1p_ref : (Ho+2, Wo+2, C)     f32    VMEM scratch: zero-bordered conv1 output
    """
    s = stride
    C = w1_ref.shape[-1]

    # Load each phase plane once; keep it f32 so shifted slices/reshapes stay on
    # the plain 32-bit layout path (no bf16 sublane repacking).
    phases = [xph_ref[0, p].astype(jnp.float32) for p in range(s * s)]

    # ---- conv1 + bn1 + leaky_relu -------------------------------------------
    acc1 = jnp.zeros((Ho * Wo, C), jnp.float32)
    for dh in range(3):
        for dw in range(3):
            ph = (dh % s) * s + (dw % s)
            oh, ow = dh // s, dw // s
            patch = phases[ph][oh:oh + Ho, ow:ow + Wo, :]
            patch = patch.reshape(Ho * Wo, C).astype(jnp.bfloat16)
            acc1 = acc1 + jnp.dot(patch, w1_ref[dh * 3 + dw],
                                  preferred_element_type=jnp.float32)
    h1 = _leaky_relu(acc1 + b1_ref[...])

    # Stage the padded conv1 output in VMEM scratch (zero border = conv2 padding).
    # Scratch is re-zeroed every grid step: with "parallel" grid sharding the
    # second core's first step is NOT program_id 0, so a one-time init is unsafe.
    h1p_ref[...] = jnp.zeros_like(h1p_ref)
    h1p_ref[1:1 + Ho, 1:1 + Wo, :] = h1.reshape(Ho, Wo, C)

    # ---- fused AvgPoolShortCut (zero channel padding is implicit: the padded
    # input channels beyond in_planes are already zero) ------------------------
    if pool_mode == "subsample":            # F.avg_pool2d(x, 1, stride)
        p, o = 1 % s, 1 // s
        sc = phases[p * s + p][o:o + Ho, o:o + Wo, :]
    else:                                   # F.avg_pool2d(x, stride, stride)
        sc = jnp.zeros((Ho, Wo, C), jnp.float32)
        for a in range(s):
            for b in range(s):
                ph = ((a + 1) % s) * s + ((b + 1) % s)
                oh, ow = (a + 1) // s, (b + 1) // s
                sc = sc + phases[ph][oh:oh + Ho, ow:ow + Wo, :]
        sc = sc * (1.0 / (s * s))
    sc = sc.reshape(Ho * Wo, C)

    # ---- conv2 + bn2 + shortcut add + leaky_relu -----------------------------
    plane = h1p_ref[...]
    acc2 = jnp.zeros((Ho * Wo, C), jnp.float32)
    for dh in range(3):
        for dw in range(3):
            patch = plane[dh:dh + Ho, dw:dw + Wo, :]
            patch = patch.reshape(Ho * Wo, C).astype(jnp.bfloat16)
            acc2 = acc2 + jnp.dot(patch, w2_ref[dh * 3 + dw],
                                  preferred_element_type=jnp.float32)
    o_ref[0] = _leaky_relu(acc2 + b2_ref[...] + sc)


# ----------------------------------------------------------------------------
# Wrapper-side packing helpers (plain JAX, cheap single passes over small data)
# ----------------------------------------------------------------------------
def _fold_bn(gamma, beta, mean, var, eps=1e-5):
    scale = gamma / jnp.sqrt(var + eps)
    return scale, beta - mean * scale


def _pack_conv_bn(w_oihw, bn_params, cpad):
    """Torch-layout (Cout, Cin, 3, 3) weight -> (9, cpad, cpad) bf16 with the BN
    scale folded into output columns, plus the (1, cpad) f32 folded bias."""
    cout, cin = w_oihw.shape[:2]
    scale, bias = _fold_bn(*bn_params)
    w = jnp.transpose(w_oihw, (2, 3, 1, 0)) * scale[None, None, None, :]
    w = jnp.pad(w, ((0, 0), (0, 0), (0, cpad - cin), (0, cpad - cout)))
    w = w.reshape(9, cpad, cpad).astype(jnp.bfloat16)
    b = jnp.pad(bias, (0, cpad - cout)).reshape(1, cpad).astype(jnp.float32)
    return w, b


def _pad_and_phase_split(x_nhwc, stride):
    """Zero-pad spatially by 1 and split into stride*stride phases so the conv
    kernel only needs contiguous (un-strided) slices.
    Returns (N, stride*stride, Hq, Wq, C), Hq = ceil((H+2)/stride)."""
    N, H, W, C = x_nhwc.shape
    s = stride
    Hq = -(-(H + 2) // s)
    Wq = -(-(W + 2) // s)
    xp = jnp.pad(x_nhwc, ((0, 0), (1, Hq * s - H - 1), (1, Wq * s - W - 1), (0, 0)))
    xph = xp.reshape(N, Hq, s, Wq, s, C)
    xph = jnp.transpose(xph, (0, 2, 4, 1, 3, 5))
    return xph.reshape(N, s * s, Hq, Wq, C)


# ----------------------------------------------------------------------------
# BasicBlock forward
# ----------------------------------------------------------------------------
def basicblock_forward(params, x_nchw, stride):
    N, Cin, H, W = x_nchw.shape
    planes = params["w1"].shape[0]
    assert Cin <= planes or (stride == 1 and Cin == planes)
    if H % 2 == 0 and stride != 1:
        # PyTorch's even-H branch uses avg_pool2d(x, stride, stride); shapes only
        # line up with the conv output when stride divides H and W.
        assert H % stride == 0 and W % stride == 0, (H, W, stride)

    C = _round_up(max(Cin, planes), LANES)
    Ho = (H - 1) // stride + 1
    Wo = (W - 1) // stride + 1
    M = Ho * Wo
    pool_mode = "subsample" if H % 2 != 0 else "pool"

    # NHWC, channel-pad to 128 lanes, bf16 for the MXU inputs.
    x = jnp.transpose(x_nchw, (0, 2, 3, 1)).astype(jnp.float32)
    xq = jnp.pad(x, ((0, 0), (0, 0), (0, 0), (0, C - Cin))).astype(jnp.bfloat16)
    xph = _pad_and_phase_split(xq, stride)              # (N, s*s, Hq, Wq, C)
    _, ss, Hq, Wq, _ = xph.shape

    w1, b1 = _pack_conv_bn(params["w1"], params["bn1"], C)
    w2, b2 = _pack_conv_bn(params["w2"], params["bn2"], C)

    out2d = pl.pallas_call(
        partial(_basicblock_kernel, stride=stride, Ho=Ho, Wo=Wo,
                pool_mode=pool_mode),
        out_shape=jax.ShapeDtypeStruct((N, M, C), jnp.float32),
        grid=(N,),
        in_specs=[
            pl.BlockSpec((1, ss, Hq, Wq, C), lambda i: (i, 0, 0, 0, 0)),
            pl.BlockSpec((9, C, C), lambda i: (0, 0, 0)),
            pl.BlockSpec((1, C), lambda i: (0, 0)),
            pl.BlockSpec((9, C, C), lambda i: (0, 0, 0)),
            pl.BlockSpec((1, C), lambda i: (0, 0)),
        ],
        out_specs=pl.BlockSpec((1, M, C), lambda i: (i, 0, 0)),
        scratch_shapes=[pltpu.VMEM((Ho + 2, Wo + 2, C), jnp.float32)],
        compiler_params=pltpu.CompilerParams(
            dimension_semantics=("parallel",)),
    )(xph, w1, b1, w2, b2)

    out = out2d.reshape(N, Ho, Wo, C)[:, :, :, :planes]
    return jnp.transpose(out, (0, 3, 1, 2))             # back to NCHW


# ----------------------------------------------------------------------------
# Pure-f32 JAX reference (mirrors the PyTorch module, eval-mode BN)
# ----------------------------------------------------------------------------
def _reference_forward(params, x, stride):
    def conv(z, w, s):
        return jax.lax.conv_general_dilated(
            z, w, window_strides=(s, s), padding=((1, 1), (1, 1)),
            dimension_numbers=("NCHW", "OIHW", "NCHW"))

    def bn(z, p):
        gamma, beta, mean, var = [a[None, :, None, None] for a in p]
        return (z - mean) / jnp.sqrt(var + 1e-5) * gamma + beta

    h = _leaky_relu(bn(conv(x, params["w1"], stride), params["bn1"]))
    h = bn(conv(h, params["w2"], 1), params["bn2"])

    N, Cin, H, W = x.shape
    planes = params["w1"].shape[0]
    if stride != 1 or Cin != planes:
        if H % 2 != 0:
            sc = x[:, :, ::stride, ::stride]
        else:
            Hc, Wc = (H // stride) * stride, (W // stride) * stride
            sc = x[:, :, :Hc, :Wc].reshape(
                N, Cin, H // stride, stride, W // stride, stride).mean(axis=(3, 5))
        sc = jnp.pad(sc, ((0, 0), (0, planes - Cin), (0, 0), (0, 0)))
    else:
        sc = x
    return _leaky_relu(h + sc)


# ----------------------------------------------------------------------------
# Parameter init (PyTorch-like conv init, randomized eval-mode BN stats)
# ----------------------------------------------------------------------------
def init_basicblock_params(key, in_planes, planes):
    ks = jax.random.split(key, 4)

    def conv_w(k, cout, cin):
        bound = 1.0 / math.sqrt(cin * 9)
        return jax.random.uniform(k, (cout, cin, 3, 3), jnp.float32, -bound, bound)

    def bn(k, c):
        k1, k2, k3 = jax.random.split(k, 3)
        gamma = 1.0 + 0.1 * jax.random.normal(k1, (c,), jnp.float32)
        beta = 0.1 * jax.random.normal(k2, (c,), jnp.float32)
        mean = 0.1 * jax.random.normal(k3, (c,), jnp.float32)
        var = jnp.ones((c,), jnp.float32)
        return gamma, beta, mean, var

    return dict(
        w1=conv_w(ks[0], planes, in_planes), bn1=bn(ks[1], planes),
        w2=conv_w(ks[2], planes, planes),    bn2=bn(ks[3], planes),
    )


if __name__ == "__main__":
    key = jax.random.PRNGKey(0)

    # --- case 1: stride=2, in_planes=4 -> planes=8 (AvgPoolShortCut branch) ---
    N, in_planes, planes, H, W, stride = 2, 4, 8, 16, 16, 2
    kx, kp, key = jax.random.split(key, 3)
    x = jax.random.normal(kx, (N, in_planes, H, W), jnp.float32)
    params = init_basicblock_params(kp, in_planes, planes)

    fwd = jax.jit(partial(basicblock_forward, stride=stride))
    out = jax.block_until_ready(fwd(params, x))

    Ho = (H - 1) // stride + 1
    Wo = (W - 1) // stride + 1
    assert out.shape == (N, planes, Ho, Wo), out.shape
    assert bool(jnp.isfinite(out).all())
    ref = _reference_forward(params, x, stride)
    np.testing.assert_allclose(np.asarray(out), np.asarray(ref),
                               atol=1e-1, rtol=1e-1)

    # --- case 2: stride=1, in_planes == planes (identity shortcut branch) -----
    N2, planes2, H2, W2 = 2, 8, 16, 16
    kx2, kp2, key = jax.random.split(key, 3)
    x2 = jax.random.normal(kx2, (N2, planes2, H2, W2), jnp.float32)
    params2 = init_basicblock_params(kp2, planes2, planes2)

    fwd1 = jax.jit(partial(basicblock_forward, stride=1))
    out2 = jax.block_until_ready(fwd1(params2, x2))
    assert out2.shape == (N2, planes2, H2, W2), out2.shape
    assert bool(jnp.isfinite(out2).all())
    ref2 = _reference_forward(params2, x2, 1)
    np.testing.assert_allclose(np.asarray(out2), np.asarray(ref2),
                               atol=1e-1, rtol=1e-1)

    print("KERNEL_OK")
</pallas_src>

<mosaic_0001>
module attributes {stable_mosaic.version = 11 : i64} {
  func.func @_basicblock_kernel(%arg0: i32, %arg1: memref<1x4x9x9x128xbf16, #tpu.memory_space<vmem>>, %arg2: memref<9x128x128xbf16, #tpu.memory_space<vmem>>, %arg3: memref<1x128xf32, #tpu.memory_space<vmem>>, %arg4: memref<9x128x128xbf16, #tpu.memory_space<vmem>>, %arg5: memref<1x128xf32, #tpu.memory_space<vmem>>, %arg6: memref<1x64x128xf32, #tpu.memory_space<vmem>>, %arg7: memref<10x10x128xf32, #tpu.memory_space<vmem>>) attributes {dimension_semantics = [#tpu.dimension_semantics<parallel>], iteration_bounds = array<i64: 2>, scalar_prefetch = 0 : i64, scratch_operands = 1 : i64, tpu.core_type = #tpu.core_type<tc>, window_params = [{transform_indices = @transform_0, window_bounds = array<i64: 1, 4, 9, 9, 128>}, {pipeline_mode = #tpu.pipeline_mode<synchronous>, transform_indices = @transform_1, window_bounds = array<i64: 9, 128, 128>}, {pipeline_mode = #tpu.pipeline_mode<synchronous>, transform_indices = @transform_2, window_bounds = array<i64: 1, 128>}, {pipeline_mode = #tpu.pipeline_mode<synchronous>, transform_indices = @transform_3, window_bounds = array<i64: 9, 128, 128>}, {pipeline_mode = #tpu.pipeline_mode<synchronous>, transform_indices = @transform_4, window_bounds = array<i64: 1, 128>}, {transform_indices = @transform_5, window_bounds = array<i64: 1, 64, 128>}]} {
    %c0 = arith.constant 0 : index
    %c0_0 = arith.constant 0 : index
    %c0_1 = arith.constant 0 : index
    %c0_2 = arith.constant 0 : index
    %c0_3 = arith.constant 0 : index
    %0 = vector.load %arg1[%c0, %c0_0, %c0_1, %c0_2, %c0_3] : memref<1x4x9x9x128xbf16, #tpu.memory_space<vmem>>, vector<1x1x9x9x128xbf16>
    %1 = vector.shape_cast %0 : vector<1x1x9x9x128xbf16> to vector<9x9x128xbf16>
    %2 = arith.extf %1 : vector<9x9x128xbf16> to vector<9x9x128xf32>
    %c0_4 = arith.constant 0 : index
    %c1 = arith.constant 1 : index
    %c0_5 = arith.constant 0 : index
    %c0_6 = arith.constant 0 : index
    %c0_7 = arith.constant 0 : index
    %3 = vector.load %arg1[%c0_4, %c1, %c0_5, %c0_6, %c0_7] : memref<1x4x9x9x128xbf16, #tpu.memory_space<vmem>>, vector<1x1x9x9x128xbf16>
    %4 = vector.shape_cast %3 : vector<1x1x9x9x128xbf16> to vector<9x9x128xbf16>
    %5 = arith.extf %4 : vector<9x9x128xbf16> to vector<9x9x128xf32>
    %c0_8 = arith.constant 0 : index
    %c2 = arith.constant 2 : index
    %c0_9 = arith.constant 0 : index
    %c0_10 = arith.constant 0 : index
    %c0_11 = arith.constant 0 : index
    %6 = vector.load %arg1[%c0_8, %c2, %c0_9, %c0_10, %c0_11] : memref<1x4x9x9x128xbf16, #tpu.memory_space<vmem>>, vector<1x1x9x9x128xbf16>
    %7 = vector.shape_cast %6 : vector<1x1x9x9x128xbf16> to vector<9x9x128xbf16>
    %8 = arith.extf %7 : vector<9x9x128xbf16> to vector<9x9x128xf32>
    %c0_12 = arith.constant 0 : index
    %c3 = arith.constant 3 : index
    %c0_13 = arith.constant 0 : index
    %c0_14 = arith.constant 0 : index
    %c0_15 = arith.constant 0 : index
    %9 = vector.load %arg1[%c0_12, %c3, %c0_13, %c0_14, %c0_15] : memref<1x4x9x9x128xbf16, #tpu.memory_space<vmem>>, vector<1x1x9x9x128xbf16>
    %10 = vector.shape_cast %9 : vector<1x1x9x9x128xbf16> to vector<9x9x128xbf16>
    %11 = arith.extf %10 : vector<9x9x128xbf16> to vector<9x9x128xf32>
    %cst = arith.constant 0.000000e+00 : f32
    %12 = vector.broadcast %cst : f32 to vector<64x128xf32>
    %13 = vector.extract_strided_slice %2 {offsets = [0, 0, 0], sizes = [8, 8, 128], strides = [1, 1, 1]} : vector<9x9x128xf32> to vector<8x8x128xf32>
    %14 = vector.shape_cast %13 : vector<8x8x128xf32> to vector<64x128xf32>
    %15 = arith.truncf %14 : vector<64x128xf32> to vector<64x128xbf16>
    %c0_16 = arith.constant 0 : index
    %c0_17 = arith.constant 0 : index
    %c0_18 = arith.constant 0 : index
    %16 = vector.load %arg2[%c0_16, %c0_17, %c0_18] : memref<9x128x128xbf16, #tpu.memory_space<vmem>>, vector<1x128x128xbf16>
    %17 = vector.shape_cast %16 : vector<1x128x128xbf16> to vector<128x128xbf16>
    %cst_19 = arith.constant dense<0.000000e+00> : vector<64x128xf32>
    %18 = tpu.matmul %15, %17, %cst_19 {dimension_numbers = #tpu.dot_dimension_numbers<[1], [0], [0], [1], [0, 0, 1, 1], [], []>} : vector<64x128xbf16>, vector<128x128xbf16>, vector<64x128xf32> -> vector<64x128xf32>
    %19 = arith.addf %12, %18 : vector<64x128xf32>
    %20 = vector.extract_strided_slice %5 {offsets = [0, 0, 0], sizes = [8, 8, 128], strides = [1, 1, 1]} : vector<9x9x128xf32> to vector<8x8x128xf32>
    %21 = vector.shape_cast %20 : vector<8x8x128xf32> to vector<64x128xf32>
    %22 = arith.truncf %21 : vector<64x128xf32> to vector<64x128xbf16>
    %c1_20 = arith.constant 1 : index
    %c0_21 = arith.constant 0 : index
    %c0_22 = arith.constant 0 : index
    %23 = vector.load %arg2[%c1_20, %c0_21, %c0_22] : memref<9x128x128xbf16, #tpu.memory_space<vmem>>, vector<1x128x128xbf16>
    %24 = vector.shape_cast %23 : vector<1x128x128xbf16> to vector<128x128xbf16>
    %cst_23 = arith.constant dense<0.000000e+00> : vector<64x128xf32>
    %25 = tpu.matmul %22, %24, %cst_23 {dimension_numbers = #tpu.dot_dimension_numbers<[1], [0], [0], [1], [0, 0, 1, 1], [], []>} : vector<64x128xbf16>, vector<128x128xbf16>, vector<64x128xf32> -> vector<64x128xf32>
    %26 = arith.addf %19, %25 : vector<64x128xf32>
    %27 = vector.extract_strided_slice %2 {offsets = [0, 1, 0], sizes = [8, 8, 128], strides = [1, 1, 1]} : vector<9x9x128xf32> to vector<8x8x128xf32>
    %28 = vector.shape_cast %27 : vector<8x8x128xf32> to vector<64x128xf32>
    %29 = arith.truncf %28 : vector<64x128xf32> to vector<64x128xbf16>
    %c2_24 = arith.constant 2 : index
    %c0_25 = arith.constant 0 : index
    %c0_26 = arith.constant 0 : index
    %30 = vector.load %arg2[%c2_24, %c0_25, %c0_26] : memref<9x128x128xbf16, #tpu.memory_space<vmem>>, vector<1x128x128xbf16>
    %31 = vector.shape_cast %30 : vector<1x128x128xbf16> to vector<128x128xbf16>
    %cst_27 = arith.constant dense<0.000000e+00> : vector<64x128xf32>
    %32 = tpu.matmul %29, %31, %cst_27 {dimension_numbers = #tpu.dot_dimension_numbers<[1], [0], [0], [1], [0, 0, 1, 1], [], []>} : vector<64x128xbf16>, vector<128x128xbf16>, vector<64x128xf32> -> vector<64x128xf32>
    %33 = arith.addf %26, %32 : vector<64x128xf32>
    %34 = vector.extract_strided_slice %8 {offsets = [0, 0, 0], sizes = [8, 8, 128], strides = [1, 1, 1]} : vector<9x9x128xf32> to vector<8x8x128xf32>
    %35 = vector.shape_cast %34 : vector<8x8x128xf32> to vector<64x128xf32>
    %36 = arith.truncf %35 : vector<64x128xf32> to vector<64x128xbf16>
    %c3_28 = arith.constant 3 : index
    %c0_29 = arith.constant 0 : index
    %c0_30 = arith.constant 0 : index
    %37 = vector.load %arg2[%c3_28, %c0_29, %c0_30] : memref<9x128x128xbf16, #tpu.memory_space<vmem>>, vector<1x128x128xbf16>
    %38 = vector.shape_cast %37 : vector<1x128x128xbf16> to vector<128x128xbf16>
    %cst_31 = arith.constant dense<0.000000e+00> : vector<64x128xf32>
    %39 = tpu.matmul %36, %38, %cst_31 {dimension_numbers = #tpu.dot_dimension_numbers<[1], [0], [0], [1], [0, 0, 1, 1], [], []>} : vector<64x128xbf16>, vector<128x128xbf16>, vector<64x128xf32> -> vector<64x128xf32>
    %40 = arith.addf %33, %39 : vector<64x128xf32>
    %41 = vector.extract_strided_slice %11 {offsets = [0, 0, 0], sizes = [8, 8, 128], strides = [1, 1, 1]} : vector<9x9x128xf32> to vector<8x8x128xf32>
    %42 = vector.shape_cast %41 : vector<8x8x128xf32> to vector<64x128xf32>
    %43 = arith.truncf %42 : vector<64x128xf32> to vector<64x128xbf16>
    %c4 = arith.constant 4 : index
    %c0_32 = arith.constant 0 : index
    %c0_33 = arith.constant 0 : index
    %44 = vector.load %arg2[%c4, %c0_32, %c0_33] : memref<9x128x128xbf16, #tpu.memory_space<vmem>>, vector<1x128x128xbf16>
    %45 = vector.shape_cast %44 : vector<1x128x128xbf16> to vector<128x128xbf16>
    %cst_34 = arith.constant dense<0.000000e+00> : vector<64x128xf32>
    %46 = tpu.matmul %43, %45, %cst_34 {dimension_numbers = #tpu.dot_dimension_numbers<[1], [0], [0], [1], [0, 0, 1, 1], [], []>} : vector<64x128xbf16>, vector<128x128xbf16>, vector<64x128xf32> -> vector<64x128xf32>
    %47 = arith.addf %40, %46 : vector<64x128xf32>
    %48 = vector.extract_strided_slice %8 {offsets = [0, 1, 0], sizes = [8, 8, 128], strides = [1, 1, 1]} : vector<9x9x128xf32> to vector<8x8x128xf32>
    %49 = vector.shape_cast %48 : vector<8x8x128xf32> to vector<64x128xf32>
    %50 = arith.truncf %49 : vector<64x128xf32> to vector<64x128xbf16>
    %c5 = arith.constant 5 : index
    %c0_35 = arith.constant 0 : index
    %c0_36 = arith.constant 0 : index
    %51 = vector.load %arg2[%c5, %c0_35, %c0_36] : memref<9x128x128xbf16, #tpu.memory_space<vmem>>, vector<1x128x128xbf16>
    %52 = vector.shape_cast %51 : vector<1x128x128xbf16> to vector<128x128xbf16>
    %cst_37 = arith.constant dense<0.000000e+00> : vector<64x128xf32>
    %53 = tpu.matmul %50, %52, %cst_37 {dimension_numbers = #tpu.dot_dimension_numbers<[1], [0], [0], [1], [0, 0, 1, 1], [], []>} : vector<64x128xbf16>, vector<128x128xbf16>, vector<64x128xf32> -> vector<64x128xf32>
    %54 = arith.addf %47, %53 : vector<64x128xf32>
    %55 = vector.extract_strided_slice %2 {offsets = [1, 0, 0], sizes = [8, 8, 128], strides = [1, 1, 1]} : vector<9x9x128xf32> to vector<8x8x128xf32>
    %56 = vector.shape_cast %55 : vector<8x8x128xf32> to vector<64x128xf32>
    %57 = arith.truncf %56 : vector<64x128xf32> to vector<64x128xbf16>
    %c6 = arith.constant 6 : index
    %c0_38 = arith.constant 0 : index
    %c0_39 = arith.constant 0 : index
    %58 = vector.load %arg2[%c6, %c0_38, %c0_39] : memref<9x128x128xbf16, #tpu.memory_space<vmem>>, vector<1x128x128xbf16>
    %59 = vector.shape_cast %58 : vector<1x128x128xbf16> to vector<128x128xbf16>
    %cst_40 = arith.constant dense<0.000000e+00> : vector<64x128xf32>
    %60 = tpu.matmul %57, %59, %cst_40 {dimension_numbers = #tpu.dot_dimension_numbers<[1], [0], [0], [1], [0, 0, 1, 1], [], []>} : vector<64x128xbf16>, vector<128x128xbf16>, vector<64x128xf32> -> vector<64x128xf32>
    %61 = arith.addf %54, %60 : vector<64x128xf32>
    %62 = vector.extract_strided_slice %5 {offsets = [1, 0, 0], sizes = [8, 8, 128], strides = [1, 1, 1]} : vector<9x9x128xf32> to vector<8x8x128xf32>
    %63 = vector.shape_cast %62 : vector<8x8x128xf32> to vector<64x128xf32>
    %64 = arith.truncf %63 : vector<64x128xf32> to vector<64x128xbf16>
    %c7 = arith.constant 7 : index
    %c0_41 = arith.constant 0 : index
    %c0_42 = arith.constant 0 : index
    %65 = vector.load %arg2[%c7, %c0_41, %c0_42] : memref<9x128x128xbf16, #tpu.memory_space<vmem>>, vector<1x128x128xbf16>
    %66 = vector.shape_cast %65 : vector<1x128x128xbf16> to vector<128x128xbf16>
    %cst_43 = arith.constant dense<0.000000e+00> : vector<64x128xf32>
    %67 = tpu.matmul %64, %66, %cst_43 {dimension_numbers = #tpu.dot_dimension_numbers<[1], [0], [0], [1], [0, 0, 1, 1], [], []>} : vector<64x128xbf16>, vector<128x128xbf16>, vector<64x128xf32> -> vector<64x128xf32>
    %68 = arith.addf %61, %67 : vector<64x128xf32>
    %69 = vector.extract_strided_slice %2 {offsets = [1, 1, 0], sizes = [8, 8, 128], strides = [1, 1, 1]} : vector<9x9x128xf32> to vector<8x8x128xf32>
    %70 = vector.shape_cast %69 : vector<8x8x128xf32> to vector<64x128xf32>
    %71 = arith.truncf %70 : vector<64x128xf32> to vector<64x128xbf16>
    %c8 = arith.constant 8 : index
    %c0_44 = arith.constant 0 : index
    %c0_45 = arith.constant 0 : index
    %72 = vector.load %arg2[%c8, %c0_44, %c0_45] : memref<9x128x128xbf16, #tpu.memory_space<vmem>>, vector<1x128x128xbf16>
    %73 = vector.shape_cast %72 : vector<1x128x128xbf16> to vector<128x128xbf16>
    %cst_46 = arith.constant dense<0.000000e+00> : vector<64x128xf32>
    %74 = tpu.matmul %71, %73, %cst_46 {dimension_numbers = #tpu.dot_dimension_numbers<[1], [0], [0], [1], [0, 0, 1, 1], [], []>} : vector<64x128xbf16>, vector<128x128xbf16>, vector<64x128xf32> -> vector<64x128xf32>
    %75 = arith.addf %68, %74 : vector<64x128xf32>
    %c0_47 = arith.constant 0 : index
    %c0_48 = arith.constant 0 : index
    %76 = vector.load %arg3[%c0_47, %c0_48] : memref<1x128xf32, #tpu.memory_space<vmem>>, vector<1x128xf32>
    %77 = vector.broadcast %76 : vector<1x128xf32> to vector<64x128xf32>
    %78 = arith.addf %75, %77 : vector<64x128xf32>
    %cst_49 = arith.constant 0.000000e+00 : f32
    %79 = vector.broadcast %cst_49 : f32 to vector<64x128xf32>
    %80 = arith.cmpf ogt, %78, %79 : vector<64x128xf32>
    %cst_50 = arith.constant 0.00999999977 : f32
    %81 = vector.broadcast %cst_50 : f32 to vector<64x128xf32>
    %82 = arith.mulf %81, %78 : vector<64x128xf32>
    %83 = arith.select %80, %78, %82 : vector<64x128xi1>, vector<64x128xf32>
    %cst_51 = arith.constant 0.000000e+00 : f32
    %84 = vector.broadcast %cst_51 : f32 to vector<10x10x128xf32>
    %c0_52 = arith.constant 0 : index
    %c0_53 = arith.constant 0 : index
    %c0_54 = arith.constant 0 : index
    %85 = vector.load %arg7[%c0_52, %c0_53, %c0_54] : memref<10x10x128xf32, #tpu.memory_space<vmem>>, vector<10x10x128xf32>
    tpu.vector_store %arg7[%c0_52, %c0_53, %c0_54], %84 {strides = array<i32>} : memref<10x10x128xf32, #tpu.memory_space<vmem>>, vector<10x10x128xf32>,
    %86 = vector.shape_cast %83 : vector<64x128xf32> to vector<8x8x128xf32>
    %c1_55 = arith.constant 1 : index
    %c1_56 = arith.constant 1 : index
    %c0_57 = arith.constant 0 : index
    %87 = vector.load %arg7[%c1_55, %c1_56, %c0_57] : memref<10x10x128xf32, #tpu.memory_space<vmem>>, vector<8x8x128xf32>
    tpu.vector_store %arg7[%c1_55, %c1_56, %c0_57], %86 {strides = array<i32>} : memref<10x10x128xf32, #tpu.memory_space<vmem>>, vector<8x8x128xf32>,
    %cst_58 = arith.constant 0.000000e+00 : f32
    %88 = vector.broadcast %cst_58 : f32 to vector<8x8x128xf32>
    %89 = vector.extract_strided_slice %11 {offsets = [0, 0, 0], sizes = [8, 8, 128], strides = [1, 1, 1]} : vector<9x9x128xf32> to vector<8x8x128xf32>
    %90 = arith.addf %88, %89 : vector<8x8x128xf32>
    %91 = vector.extract_strided_slice %8 {offsets = [0, 1, 0], sizes = [8, 8, 128], strides = [1, 1, 1]} : vector<9x9x128xf32> to vector<8x8x128xf32>
    %92 = arith.addf %90, %91 : vector<8x8x128xf32>
    %93 = vector.extract_strided_slice %5 {offsets = [1, 0, 0], sizes = [8, 8, 128], strides = [1, 1, 1]} : vector<9x9x128xf32> to vector<8x8x128xf32>
    %94 = arith.addf %92, %93 : vector<8x8x128xf32>
    %95 = vector.extract_strided_slice %2 {offsets = [1, 1, 0], sizes = [8, 8, 128], strides = [1, 1, 1]} : vector<9x9x128xf32> to vector<8x8x128xf32>
    %96 = arith.addf %94, %95 : vector<8x8x128xf32>
    %cst_59 = arith.constant 2.500000e-01 : f32
    %97 = vector.broadcast %cst_59 : f32 to vector<8x8x128xf32>
    %98 = arith.mulf %96, %97 : vector<8x8x128xf32>
    %99 = vector.shape_cast %98 : vector<8x8x128xf32> to vector<64x128xf32>
    %c0_60 = arith.constant 0 : index
    %c0_61 = arith.constant 0 : index
    %c0_62 = arith.constant 0 : index
    %100 = vector.load %arg7[%c0_60, %c0_61, %c0_62] : memref<10x10x128xf32, #tpu.memory_space<vmem>>, vector<10x10x128xf32>
    %cst_63 = arith.constant 0.000000e+00 : f32
    %101 = vector.broadcast %cst_63 : f32 to vector<64x128xf32>
    %102 = vector.extract_strided_slice %100 {offsets = [0, 0, 0], sizes = [8, 8, 128], strides = [1, 1, 1]} : vector<10x10x128xf32> to vector<8x8x128xf32>
    %103 = vector.shape_cast %102 : vector<8x8x128xf32> to vector<64x128xf32>
    %104 = arith.truncf %103 : vector<64x128xf32> to vector<64x128xbf16>
    %c0_64 = arith.constant 0 : index
    %c0_65 = arith.constant 0 : index
    %c0_66 = arith.constant 0 : index
    %105 = vector.load %arg4[%c0_64, %c0_65, %c0_66] : memref<9x128x128xbf16, #tpu.memory_space<vmem>>, vector<1x128x128xbf16>
    %106 = vector.shape_cast %105 : vector<1x128x128xbf16> to vector<128x128xbf16>
    %cst_67 = arith.constant dense<0.000000e+00> : vector<64x128xf32>
    %107 = tpu.matmul %104, %106, %cst_67 {dimension_numbers = #tpu.dot_dimension_numbers<[1], [0], [0], [1], [0, 0, 1, 1], [], []>} : vector<64x128xbf16>, vector<128x128xbf16>, vector<64x128xf32> -> vector<64x128xf32>
    %108 = arith.addf %101, %107 : vector<64x128xf32>
    %109 = vector.extract_strided_slice %100 {offsets = [0, 1, 0], sizes = [8, 8, 128], strides = [1, 1, 1]} : vector<10x10x128xf32> to vector<8x8x128xf32>
    %110 = vector.shape_cast %109 : vector<8x8x128xf32> to vector<64x128xf32>
    %111 = arith.truncf %110 : vector<64x128xf32> to vector<64x128xbf16>
    %c1_68 = arith.constant 1 : index
    %c0_69 = arith.constant 0 : index
    %c0_70 = arith.constant 0 : index
    %112 = vector.load %arg4[%c1_68, %c0_69, %c0_70] : memref<9x128x128xbf16, #tpu.memory_space<vmem>>, vector<1x128x128xbf16>
    %113 = vector.shape_cast %112 : vector<1x128x128xbf16> to vector<128x128xbf16>
    %cst_71 = arith.constant dense<0.000000e+00> : vector<64x128xf32>
    %114 = tpu.matmul %111, %113, %cst_71 {dimension_numbers = #tpu.dot_dimension_numbers<[1], [0], [0], [1], [0, 0, 1, 1], [], []>} : vector<64x128xbf16>, vector<128x128xbf16>, vector<64x128xf32> -> vector<64x128xf32>
    %115 = arith.addf %108, %114 : vector<64x128xf32>
    %116 = vector.extract_strided_slice %100 {offsets = [0, 2, 0], sizes = [8, 8, 128], strides = [1, 1, 1]} : vector<10x10x128xf32> to vector<8x8x128xf32>
    %117 = vector.shape_cast %116 : vector<8x8x128xf32> to vector<64x128xf32>
    %118 = arith.truncf %117 : vector<64x128xf32> to vector<64x128xbf16>
    %c2_72 = arith.constant 2 : index
    %c0_73 = arith.constant 0 : index
    %c0_74 = arith.constant 0 : index
    %119 = vector.load %arg4[%c2_72, %c0_73, %c0_74] : memref<9x128x128xbf16, #tpu.memory_space<vmem>>, vector<1x128x128xbf16>
    %120 = vector.shape_cast %119 : vector<1x128x128xbf16> to vector<128x128xbf16>
    %cst_75 = arith.constant dense<0.000000e+00> : vector<64x128xf32>
    %121 = tpu.matmul %118, %120, %cst_75 {dimension_numbers = #tpu.dot_dimension_numbers<[1], [0], [0], [1], [0, 0, 1, 1], [], []>} : vector<64x128xbf16>, vector<128x128xbf16>, vector<64x128xf32> -> vector<64x128xf32>
    %122 = arith.addf %115, %121 : vector<64x128xf32>
    %123 = vector.extract_strided_slice %100 {offsets = [1, 0, 0], sizes = [8, 8, 128], strides = [1, 1, 1]} : vector<10x10x128xf32> to vector<8x8x128xf32>
    %124 = vector.shape_cast %123 : vector<8x8x128xf32> to vector<64x128xf32>
    %125 = arith.truncf %124 : vector<64x128xf32> to vector<64x128xbf16>
    %c3_76 = arith.constant 3 : index
    %c0_77 = arith.constant 0 : index
    %c0_78 = arith.constant 0 : index
    %126 = vector.load %arg4[%c3_76, %c0_77, %c0_78] : memref<9x128x128xbf16, #tpu.memory_space<vmem>>, vector<1x128x128xbf16>
    %127 = vector.shape_cast %126 : vector<1x128x128xbf16> to vector<128x128xbf16>
    %cst_79 = arith.constant dense<0.000000e+00> : vector<64x128xf32>
    %128 = tpu.matmul %125, %127, %cst_79 {dimension_numbers = #tpu.dot_dimension_numbers<[1], [0], [0], [1], [0, 0, 1, 1], [], []>} : vector<64x128xbf16>, vector<128x128xbf16>, vector<64x128xf32> -> vector<64x128xf32>
    %129 = arith.addf %122, %128 : vector<64x128xf32>
    %130 = vector.extract_strided_slice %100 {offsets = [1, 1, 0], sizes = [8, 8, 128], strides = [1, 1, 1]} : vector<10x10x128xf32> to vector<8x8x128xf32>
    %131 = vector.shape_cast %130 : vector<8x8x128xf32> to vector<64x128xf32>
    %132 = arith.truncf %131 : vector<64x128xf32> to vector<64x128xbf16>
    %c4_80 = arith.constant 4 : index
    %c0_81 = arith.constant 0 : index
    %c0_82 = arith.constant 0 : index
    %133 = vector.load %arg4[%c4_80, %c0_81, %c0_82] : memref<9x128x128xbf16, #tpu.memory_space<vmem>>, vector<1x128x128xbf16>
    %134 = vector.shape_cast %133 : vector<1x128x128xbf16> to vector<128x128xbf16>
    %cst_83 = arith.constant dense<0.000000e+00> : vector<64x128xf32>
    %135 = tpu.matmul %132, %134, %cst_83 {dimension_numbers = #tpu.dot_dimension_numbers<[1], [0], [0], [1], [0, 0, 1, 1], [], []>} : vector<64x128xbf16>, vector<128x128xbf16>, vector<64x128xf32> -> vector<64x128xf32>
    %136 = arith.addf %129, %135 : vector<64x128xf32>
    %137 = vector.extract_strided_slice %100 {offsets = [1, 2, 0], sizes = [8, 8, 128], strides = [1, 1, 1]} : vector<10x10x128xf32> to vector<8x8x128xf32>
    %138 = vector.shape_cast %137 : vector<8x8x128xf32> to vector<64x128xf32>
    %139 = arith.truncf %138 : vector<64x128xf32> to vector<64x128xbf16>
    %c5_84 = arith.constant 5 : index
    %c0_85 = arith.constant 0 : index
    %c0_86 = arith.constant 0 : index
    %140 = vector.load %arg4[%c5_84, %c0_85, %c0_86] : memref<9x128x128xbf16, #tpu.memory_space<vmem>>, vector<1x128x128xbf16>
    %141 = vector.shape_cast %140 : vector<1x128x128xbf16> to vector<128x128xbf16>
    %cst_87 = arith.constant dense<0.000000e+00> : vector<64x128xf32>
    %142 = tpu.matmul %139, %141, %cst_87 {dimension_numbers = #tpu.dot_dimension_numbers<[1], [0], [0], [1], [0, 0, 1, 1], [], []>} : vector<64x128xbf16>, vector<128x128xbf16>, vector<64x128xf32> -> vector<64x128xf32>
    %143 = arith.addf %136, %142 : vector<64x128xf32>
    %144 = vector.extract_strided_slice %100 {offsets = [2, 0, 0], sizes = [8, 8, 128], strides = [1, 1, 1]} : vector<10x10x128xf32> to vector<8x8x128xf32>
    %145 = vector.shape_cast %144 : vector<8x8x128xf32> to vector<64x128xf32>
    %146 = arith.truncf %145 : vector<64x128xf32> to vector<64x128xbf16>
    %c6_88 = arith.constant 6 : index
    %c0_89 = arith.constant 0 : index
    %c0_90 = arith.constant 0 : index
    %147 = vector.load %arg4[%c6_88, %c0_89, %c0_90] : memref<9x128x128xbf16, #tpu.memory_space<vmem>>, vector<1x128x128xbf16>
    %148 = vector.shape_cast %147 : vector<1x128x128xbf16> to vector<128x128xbf16>
    %cst_91 = arith.constant dense<0.000000e+00> : vector<64x128xf32>
    %149 = tpu.matmul %146, %148, %cst_91 {dimension_numbers = #tpu.dot_dimension_numbers<[1], [0], [0], [1], [0, 0, 1, 1], [], []>} : vector<64x128xbf16>, vector<128x128xbf16>, vector<64x128xf32> -> vector<64x128xf32>
    %150 = arith.addf %143, %149 : vector<64x128xf32>
    %151 = vector.extract_strided_slice %100 {offsets = [2, 1, 0], sizes = [8, 8, 128], strides = [1, 1, 1]} : vector<10x10x128xf32> to vector<8x8x128xf32>
    %152 = vector.shape_cast %151 : vector<8x8x128xf32> to vector<64x128xf32>
    %153 = arith.truncf %152 : vector<64x128xf32> to vector<64x128xbf16>
    %c7_92 = arith.constant 7 : index
    %c0_93 = arith.constant 0 : index
    %c0_94 = arith.constant 0 : index
    %154 = vector.load %arg4[%c7_92, %c0_93, %c0_94] : memref<9x128x128xbf16, #tpu.memory_space<vmem>>, vector<1x128x128xbf16>
    %155 = vector.shape_cast %154 : vector<1x128x128xbf16> to vector<128x128xbf16>
    %cst_95 = arith.constant dense<0.000000e+00> : vector<64x128xf32>
    %156 = tpu.matmul %153, %155, %cst_95 {dimension_numbers = #tpu.dot_dimension_numbers<[1], [0], [0], [1], [0, 0, 1, 1], [], []>} : vector<64x128xbf16>, vector<128x128xbf16>, vector<64x128xf32> -> vector<64x128xf32>
    %157 = arith.addf %150, %156 : vector<64x128xf32>
    %158 = vector.extract_strided_slice %100 {offsets = [2, 2, 0], sizes = [8, 8, 128], strides = [1, 1, 1]} : vector<10x10x128xf32> to vector<8x8x128xf32>
    %159 = vector.shape_cast %158 : vector<8x8x128xf32> to vector<64x128xf32>
    %160 = arith.truncf %159 : vector<64x128xf32> to vector<64x128xbf16>
    %c8_96 = arith.constant 8 : index
    %c0_97 = arith.constant 0 : index
    %c0_98 = arith.constant 0 : index
    %161 = vector.load %arg4[%c8_96, %c0_97, %c0_98] : memref<9x128x128xbf16, #tpu.memory_space<vmem>>, vector<1x128x128xbf16>
    %162 = vector.shape_cast %161 : vector<1x128x128xbf16> to vector<128x128xbf16>
    %cst_99 = arith.constant dense<0.000000e+00> : vector<64x128xf32>
    %163 = tpu.matmul %160, %162, %cst_99 {dimension_numbers = #tpu.dot_dimension_numbers<[1], [0], [0], [1], [0, 0, 1, 1], [], []>} : vector<64x128xbf16>, vector<128x128xbf16>, vector<64x128xf32> -> vector<64x128xf32>
    %164 = arith.addf %157, %163 : vector<64x128xf32>
    %c0_100 = arith.constant 0 : index
    %c0_101 = arith.constant 0 : index
    %165 = vector.load %arg5[%c0_100, %c0_101] : memref<1x128xf32, #tpu.memory_space<vmem>>, vector<1x128xf32>
    %166 = vector.broadcast %165 : vector<1x128xf32> to vector<64x128xf32>
    %167 = arith.addf %164, %166 : vector<64x128xf32>
    %168 = arith.addf %167, %99 : vector<64x128xf32>
    %cst_102 = arith.constant 0.000000e+00 : f32
    %169 = vector.broadcast %cst_102 : f32 to vector<64x128xf32>
    %170 = arith.cmpf ogt, %168, %169 : vector<64x128xf32>
    %cst_103 = arith.constant 0.00999999977 : f32
    %171 = vector.broadcast %cst_103 : f32 to vector<64x128xf32>
    %172 = arith.mulf %171, %168 : vector<64x128xf32>
    %173 = arith.select %170, %168, %172 : vector<64x128xi1>, vector<64x128xf32>
    %c0_104 = arith.constant 0 : index
    %c0_105 = arith.constant 0 : index
    %c0_106 = arith.constant 0 : index
    %174 = vector.load %arg6[%c0_104, %c0_105, %c0_106] : memref<1x64x128xf32, #tpu.memory_space<vmem>>, vector<1x64x128xf32>
    %175 = vector.shape_cast %174 : vector<1x64x128xf32> to vector<64x128xf32>
    %176 = vector.shape_cast %173 : vector<64x128xf32> to vector<1x64x128xf32>
    tpu.vector_store %arg6[%c0_104, %c0_105, %c0_106], %176 {strides = array<i32>} : memref<1x64x128xf32, #tpu.memory_space<vmem>>, vector<1x64x128xf32>,
    return
  }
  func.func @transform_0(%arg0: i32) -> (i32, i32, i32, i32, i32) {
    %c0_i32 = arith.constant 0 : i32
    %c0_i32_0 = arith.constant 0 : i32
    %c0_i32_1 = arith.constant 0 : i32
    %c0_i32_2 = arith.constant 0 : i32
    %c0_i32_3 = arith.constant 0 : i32
    return %arg0, %c0_i32, %c0_i32_0, %c0_i32_1, %c0_i32_2 : i32, i32, i32, i32, i32
  }
  func.func @transform_1(%arg0: i32) -> (i32, i32, i32) {
    %c0_i32 = arith.constant 0 : i32
    %c0_i32_0 = arith.constant 0 : i32
    %c0_i32_1 = arith.constant 0 : i32
    %c0_i32_2 = arith.constant 0 : i32
    return %c0_i32, %c0_i32_0, %c0_i32_1 : i32, i32, i32
  }
  func.func @transform_2(%arg0: i32) -> (i32, i32) {
    %c0_i32 = arith.constant 0 : i32
    %c0_i32_0 = arith.constant 0 : i32
    %c0_i32_1 = arith.constant 0 : i32
    return %c0_i32, %c0_i32_0 : i32, i32
  }
  func.func @transform_3(%arg0: i32) -> (i32, i32, i32) {
    %c0_i32 = arith.constant 0 : i32
    %c0_i32_0 = arith.constant 0 : i32
    %c0_i32_1 = arith.constant 0 : i32
    %c0_i32_2 = arith.constant 0 : i32
    return %c0_i32, %c0_i32_0, %c0_i32_1 : i32, i32, i32
  }
  func.func @transform_4(%arg0: i32) -> (i32, i32) {
    %c0_i32 = arith.constant 0 : i32
    %c0_i32_0 = arith.constant 0 : i32
    %c0_i32_1 = arith.constant 0 : i32
    return %c0_i32, %c0_i32_0 : i32, i32
  }
  func.func @transform_5(%arg0: i32) -> (i32, i32, i32) {
    %c0_i32 = arith.constant 0 : i32
    %c0_i32_0 = arith.constant 0 : i32
    %c0_i32_1 = arith.constant 0 : i32
    return %arg0, %c0_i32, %c0_i32_0 : i32, i32, i32
  }
}

</mosaic_0001>

<bundles_post_ra>
// kernel: basicblock_forward.1
= control target key start
LH: loop header
LB: loop body
LE: loop exit
PB: predicated region body
PF: predicated region fallthrough
CT: control target
= control target key end

     0   :  { %s4627_s18 = smov 0   ;;  %s5770_s0 = inlined_call_operand.vmem [shape: bf16[2,4,9,9,128], index: 0, kind: input, shape index: {}]   ;;  %s5771_s1 = inlined_call_operand.vmem [shape: bf16[9,128,128], index: 1, kind: input, shape index: {}]   ;;  %s5772_s2 = inlined_call_operand.vmem [shape: f32[1,128], index: 2, kind: input, shape index: {}]   ;;  %s5773_s3 = inlined_call_operand.vmem [shape: bf16[9,128,128], index: 3, kind: input, shape index: {}]   ;;  %s5774_s4 = inlined_call_operand.vmem [shape: f32[1,128], index: 4, kind: input, shape index: {}]   ;;  %s5775_s5 = inlined_call_operand.vmem [shape: f32[2,64,128], index: 5, kind: output, shape index: {}]  }
   0x1 LB: > { %s3286_s19 = sadd.s32 4294967295, %s4594_s18   ;;  %p3290_p0 = scmp.ge.s32.totalorder %s4594_s18, 1  ;;  %s4594_s18 = sphi %s4627_s18, %s15_s18  }
   0x2   : > { %p187_p1 = scmp.lt.s32.totalorder %s4594_s18, 3 }
   0x4   : > { %p188_p2 = pnand %p3290_p0, %p187_p1 }
   0x6   : > { %191 = sbr.rel (%p188_p2) target bundleno = 737 (0x2e1), region = 40 }
   0xb   : > { %v4414_v0 = vld [vmem:[%s5771_s1 + $0x78] sm:$0xff]   ;;  %p215_p3 = scmp.lt.s32.totalorder %s3286_s19, 1  ;;  %v4416_v2 = vld [vmem:[%s5771_s1 + $0x70] sm:$0xff]   ;;  %v4418_v4 = vld [vmem:[%s5771_s1 + $0x68] sm:$0xff]   ;;  %vm614_vm0 = vcmask 1046528   ;;  %vm2138_vm9 = vcmask 1045504  }
   0xc   : > { %v4415_v1 = vld [vmem:[%s5771_s1 + $0x38] sm:$0xff]   ;;  %3972 = vmatprep.subr.bf16.mxu0 %v4414_v0  ;;  %v4417_v3 = vld [vmem:[%s5771_s1 + $0x30] sm:$0xff]   ;;  %v4419_v5 = vld [vmem:[%s5771_s1 + $0x28] sm:$0xff]  }
   0xd   : > { %3996 = vmatprep.subr.bf16.mxu1 %v4415_v1  ;;  %3973 = vmatpush3.bf16.msra.mxu0 %v4414_v0  ;;  %s5845_s19 = smov (!%p215_p3, %s3286_s19), 1  ;;  %v4420_v6 = vld [vmem:[%s5771_s1 + $0x60] sm:$0xff]   ;;  %v4422_v8 = vld [vmem:[%s5771_s1 + $0x58] sm:$0xff]   ;;  %v4424_v10 = vld [vmem:[%s5771_s1 + $0x50] sm:$0xff]  }
   0xe   : > { %3997 = vmatpush3.bf16.msra.mxu1 %v4415_v1  ;;  %3974 = vmatprep.subr.bf16.mxu0 %v4416_v2  ;;  %v4421_v7 = vld [vmem:[%s5771_s1 + $0x20] sm:$0xff]   ;;  %s4404_s11 = smul.u32 288, %s5845_s19  ;;  %v4423_v9 = vld [vmem:[%s5771_s1 + $0x18] sm:$0xff]   ;;  %v4425_v14 = vld [vmem:[%s5771_s1 + $0x10] sm:$0xff]   ;;  %s3755_s28 = sshll.u32 %s5845_s19, 6 }
   0xf   : > { %3998 = vmatprep.subr.bf16.mxu1 %v4417_v3  ;;  %v4426_v18 = vld [vmem:[%s5771_s1 + $0x48] sm:$0xff]   ;;  %v4428_v24 = vld [vmem:[%s5771_s1 + $0x40] sm:$0xff]   ;;  %v4434_v28 = vld [vmem:[%s5771_s1 + $0xb8] sm:$0xff]   ;;  %s5748_s6 = scalar_lea.vmem %s5775_s5, %s3755_s28 }
  0x10   : > { %s4671_s20 = scalar_lea.vmem %s5770_s0, %s4404_s11  ;;  %v4427_v21 = vld [vmem:[%s5771_s1 + $0x8] sm:$0xff]   ;;  %v4429_v25 = vld [vmem:[%s5771_s1] sm:$0xff]   ;;  %v4435_v30 = vld [vmem:[%s5771_s1 + $0xf8] sm:$0xff]  }
  0x11   : > { %3975 = vmatpush3.bf16.msra.mxu0 %v4416_v2  ;;  %v3294_v11 = vld [vmem:[%s4671_s20 + $0x48] sm:$0xf]  ;;  %v4678_v12 = vld [vmem:[%s4671_s20 + $0x50] sm:$0xf]  ;;  %v4681_v13 = vld [vmem:[%s4671_s20] sm:$0xf] }
  0x12   : > { %3999 = vmatpush3.bf16.msra.mxu1 %v4417_v3  ;;  %3976 = vmatprep.subr.bf16.mxu0 %v4418_v4  ;;  %v3331_v15 = vcombine.low %v3294_v11, %v4678_v12  ;;  %v4688_v16 = vld [vmem:[%s4671_s20 + $0x8] sm:$0xf]  ;;  %v4696_v19 = vld [vmem:[%s4671_s20 + $0x58] sm:$0xf]  ;;  %v4699_v20 = vld [vmem:[%s4671_s20 + $0x10] sm:$0xf]  ;;  %v244_v43 = vunpack.c.l.bf16 %v4681_v13 }
  0x13   : > { %4000 = vmatprep.subr.bf16.mxu1 %v4419_v5  ;;  %v3327_v17 = vcombine.low %v4681_v13, %v4688_v16  ;;  %v3471_v22 = vcombine.low %v4688_v16, %v4699_v20  ;;  %v3499_v23 = vcombine.low %v4678_v12, %v4696_v19  ;;  %v4715_v26 = vld [vmem:[%s4671_s20 + $0x60] sm:$0xf]  ;;  %v4718_v27 = vld [vmem:[%s4671_s20 + $0x18] sm:$0xf]  ;;  %v4724_v29 = vld [vmem:[%s4671_s20 + $0x68] sm:$0xf]  ;;  %v246_v50 = vunpack.c.l.bf16 %v4688_v16 }
  0x14   : > { %3988 = vmatprep.mubr.bf16.mxu0 %v3331_v15  ;;  %v4730_v31 = vld [vmem:[%s4671_s20 + $0x70] sm:$0xf]  ;;  %v3500_v32 = vcombine.low %v4715_v26, %v4724_v29  ;;  %v3332_v33 = vcombine.low %v4696_v19, %v4715_v26  ;;  %v4737_v34 = vld [vmem:[%s4671_s20 + $0x20] sm:$0xf]  ;;  %v3328_v35 = vcombine.low %v4699_v20, %v4718_v27  ;;  %v4745_v37 = vld [vmem:[%s4671_s20 + $0x28] sm:$0xf]  ;;  %v250_v13 = vunpack.c.l.bf16 %v4718_v27 }
  0x15   : > { %3977 = vmatpush3.bf16.msra.mxu0 %v4418_v4  ;;  %4012 = vmatprep.mubr.bf16.mxu1 %v3327_v17  ;;  %v4436_v36 = vld [vmem:[%s5771_s1 + $0xb0] sm:$0xff]   ;;  %v3472_v38 = vcombine.low %v4718_v27, %v4737_v34  ;;  %v4753_v40 = vld [vmem:[%s4671_s20 + $0x78] sm:$0xf]  ;;  %v3333_v41 = vcombine.low %v4724_v29, %v4730_v31  ;;  %v4438_v44 = vld [vmem:[%s5771_s1 + $0xa8] sm:$0xff]   ;;  %v3329_v45 = vcombine.low %v4737_v34, %v4745_v37  ;;  %v615_v52 = vrot.slane %v244_v43, 1 }
  0x16   : > { %4001 = vmatpush3.bf16.msra.mxu1 %v4419_v5  ;;  %3978 = vmatprep.subr.bf16.mxu0 %v4420_v6  ;;  %v4437_v39 = vld [vmem:[%s5771_s1 + $0xf0] sm:$0xff]   ;;  %v3501_v47 = vcombine.low %v4730_v31, %v4753_v40  ;;  %v4771_v48 = vld [vmem:[%s4671_s20 + $0x80] sm:$0xf]  ;;  %v4774_v49 = vld [vmem:[%s4671_s20 + $0x38] sm:$0xf]  ;;  %v618_v58 = vrot.slane %v246_v50, 1 }
  0x17   : > { %4002 = vmatprep.subr.bf16.mxu1 %v4421_v7  ;;  %v4758_v42 = vld [vmem:[%s4671_s20 + $0x30] sm:$0xf]  ;;  %v4439_v51 = vld [vmem:[%s5771_s1 + $0xe8] sm:$0xff]   ;;  %v3334_v53 = vcombine.low %v4753_v40, %v4771_v48  ;;  %v227_v54 = vld [vmem:[%s4671_s20 + $0x4] sm:$0x1] }
  0x18   : > { %v3473_v46 = vcombine.low %v4745_v37, %v4758_v42  ;;  %v3330_v55 = vcombine.low %v4758_v42, %v4774_v49  ;;  %v229_v56 = vld [vmem:[%s4671_s20 + $0xc] sm:$0x1]  ;;  %v245_v57 = vunpack.c.l.bf16 %v227_v54  ;;  %v4440_v59 = vld [vmem:[%s5771_s1 + $0xa0] sm:$0xff]   ;;  %v4790_v61 = vld [vmem:[%s4671_s20 + $0x90] sm:$0xf] }
  0x19   : > { %3979 = vmatpush3.bf16.msra.mxu0 %v4420_v6  ;;  %v247_v60 = vunpack.c.l.bf16 %v229_v56  ;;  %v4793_v62 = vld [vmem:[%s4671_s20 + $0x98] sm:$0xf]  ;;  %v231_v63 = vld [vmem:[%s4671_s20 + $0x14] sm:$0x1]  ;;  %v4441_v0 = vld [vmem:[%s5771_s1 + $0xe0] sm:$0xff]  }
  0x1a   : > { %4003 = vmatpush3.bf16.msra.mxu1 %v4421_v7  ;;  %3980 = vmatprep.subr.bf16.mxu0 %v4422_v8  ;;  %v616_v1 = vrot.slane %v245_v57, 1  ;;  %v3391_v2 = vcombine.low %v4790_v61, %v4793_v62  ;;  %v4442_v5 = vld [vmem:[%s5771_s1 + $0x98] sm:$0xff]   ;;  %v248_v7 = vunpack.c.l.bf16 %v4699_v20  ;;  %v4454_v54 = vld [vmem:[%s5771_s1 + $0x80] sm:$0xff]   ;;  %v300_v56 = vunpack.c.l.bf16 %v4793_v62  ;;  %v4492_v16 = vld [vmem:[%s5771_s1 + $0x188] sm:$0xff]  }
  0x1b   : > { %4004 = vmatprep.subr.bf16.mxu1 %v4423_v9  ;;  %v619_v3 = vrot.slane %v247_v60, 1  ;;  %v233_v11 = vld [vmem:[%s4671_s20 + $0x1c] sm:$0x1]  ;;  %v4493_v20 = vld [vmem:[%s5771_s1 + $0x1c8] sm:$0xff]   ;;  %v4582_v27 = vld [vmem:[%s4671_s20 + $0x38] sm:$0xf] }
  0x1c   : > { %v617_v4 = vsel %vm614_vm0, %v615_v52, %v616_v1  ;;  %v621_v15 = vrot.slane %v248_v7, 1  ;;  %v258_v52 = vunpack.c.l.bf16 %v4774_v49  ;;  %v4456_v60 = vld [vmem:[%s5771_s1 + $0x138] sm:$0xff]   ;;  %v1092_v7 = vrot.slane %v300_v56, 1 }
  0x1d   : > { %3981 = vmatpush3.bf16.msra.mxu0 %v4422_v8  ;;  %v4806_v6 = vsel %vm614_vm0, %v618_v58, %v619_v3  ;;  %v249_v8 = vunpack.c.l.bf16 %v231_v63  ;;  %v4455_v58 = vld [vmem:[%s5771_s1 + $0xc0] sm:$0xff]   ;;  %v273_v56 = vunpack.c.l.bf16 %v4678_v12 }
  0x1e   : > { %4005 = vmatpush3.bf16.msra.mxu1 %v4423_v9  ;;  %3982 = vmatprep.subr.bf16.mxu0 %v4424_v10  ;;  %5789 = vst [vmem:[#allocation3_spill] sm:$0xff] %v4806_v6  ;;  %v4447_v9 = vld [vmem:[%s5771_s1 + $0xd8] sm:$0xff]   ;;  %v4847_v63 = vld [vmem:[%s4671_s20 + $0xa0] sm:$0xf]  ;;  %v636_v3 = vrot.slane %v258_v52, 1 }
  0x1f   : > { %4006 = vmatprep.subr.bf16.mxu1 %v4425_v14  ;;  %v622_v17 = vrot.slane %v249_v8, 1  ;;  %v3311_v8 = vld [vmem:[%s4671_s20 + $0xb0] sm:$0xf]  ;;  %v4494_v12 = vld [vmem:[%s5771_s1 + $0x180] sm:$0xff]  }
  0x21   : > { %3983 = vmatpush3.bf16.msra.mxu0 %v4424_v10  ;;  %v647_v10 = vpack.c.bf16 %v4806_v6, %v617_v4  ;;  %v4853_v1 = vsel %vm614_vm0, %v621_v15, %v622_v17  ;;  %v4459_v4 = vld [vmem:[%s5771_s1 + $0x178] sm:$0xff]   ;;  %v4460_v15 = vld [vmem:[%s5771_s1 + $0x130] sm:$0xff]  }
  0x22   : > { %4007 = vmatpush3.bf16.msra.mxu1 %v4425_v14  ;;  %3984 = vmatprep.subr.bf16.mxu0 %v4426_v18  ;;  %v4450_v14 = vld [vmem:[%s5771_s1 + $0x90] sm:$0xff]   ;;  %5790 = vst [vmem:[#allocation4_spill] sm:$0xff] %v4853_v1  ;;  %v1553_v29 = vpack.c.bf16 %v4853_v1, %v4806_v6 }
  0x23   : > { %4008 = vmatprep.subr.bf16.mxu1 %v4427_v21 }
  0x25   : > { %3985 = vmatpush3.bf16.msra.mxu0 %v4426_v18  ;;  %v4451_v18 = vld [vmem:[%s5771_s1 + $0xd0] sm:$0xff]  }
  0x26   : > { %4009 = vmatpush3.bf16.msra.mxu1 %v4427_v21  ;;  %3986 = vmatprep.subr.bf16.mxu0 %v4428_v24  ;;  %v4452_v21 = vld [vmem:[%s5771_s1 + $0x88] sm:$0xff]  }
  0x27   : > { %4010 = vmatprep.subr.bf16.mxu1 %v4429_v25 }
  0x29   : > { %3987 = vmatpush3.bf16.msra.mxu0 %v4428_v24  ;;  %v235_v24 = vld [vmem:[%s4671_s20 + $0x24] sm:$0x1] }
  0x2a   : > { %4011 = vmatpush3.bf16.msra.mxu1 %v4429_v25  ;;  %4020 = vmatprep.subr.bf16.mxu0 %v4434_v28  ;;  %v251_v25 = vunpack.c.l.bf16 %v233_v11  ;;  %v253_v43 = vunpack.c.l.bf16 %v235_v24  ;;  %v3313_v11 = vld [vmem:[%s4671_s20 + $0xb8] sm:$0xf] }
  0x2b   : > { %4044 = vmatprep.subr.bf16.mxu1 %v4435_v30 }
  0x2c   : > { %3989 = vmatmul.mubr.bf16.vlgmr.msra.gmra.mxu0 %v3332_v33  ;;  %v624_v33 = vrot.slane %v250_v13, 1  ;;  %v625_v50 = vrot.slane %v251_v25, 1  ;;  %v4864_v13 = vld [vmem:[%s4671_s20 + $0xc0] sm:$0xf]  ;;  %v306_v25 = vunpack.c.l.bf16 %v3311_v8 }
  0x2d   : > { %4013 = vmatmul.mubr.bf16.vlgmr.msra.gmra.mxu1 %v3328_v35  ;;  %4021 = vmatpush3.bf16.msra.mxu0 %v4434_v28  ;;  %v252_v28 = vunpack.c.l.bf16 %v4737_v34  ;;  %v254_v35 = vunpack.c.l.bf16 %v4745_v37  ;;  %v4508_v37 = vld [vmem:[%s5771_s1 + $0x208] sm:$0xff]  }
  0x2e   : > { %4045 = vmatpush3.bf16.msra.mxu1 %v4435_v30  ;;  %4022 = vmatprep.subr.bf16.mxu0 %v4436_v36  ;;  %v237_v30 = vld [vmem:[%s4671_s20 + $0x2c] sm:$0x1] }
  0x2f   : > { %4046 = vmatprep.subr.bf16.mxu1 %v4437_v39  ;;  %3992 = vmatprep.mubr.bf16.mxu0 %v3333_v41  ;;  %v239_v41 = vld [vmem:[%s4671_s20 + $0x34] sm:$0x1] }
  0x30   : > { %4016 = vmatprep.mubr.bf16.mxu1 %v3329_v45  ;;  %v241_v45 = vld [vmem:[%s4671_s20 + $0x3c] sm:$0x1] }
  0x31   : > { %4023 = vmatpush3.bf16.msra.mxu0 %v4436_v36  ;;  %v4453_v36 = vld [vmem:[%s5771_s1 + $0xc8] sm:$0xff]   ;;  %v259_v49 = vunpack.c.l.bf16 %v241_v45 }
  0x32   : > { %4047 = vmatpush3.bf16.msra.mxu1 %v4437_v39  ;;  %4024 = vmatprep.subr.bf16.mxu0 %v4438_v44  ;;  %v256_v39 = vunpack.c.l.bf16 %v4758_v42 }
  0x33   : > { %4048 = vmatprep.subr.bf16.mxu1 %v4439_v51 }
  0x34   : > { %3993 = vmatmul.mubr.bf16.gmra.mxu0 %v3334_v53  ;;  %v630_v53 = vrot.slane %v254_v35, 1  ;;  %v633_v57 = vrot.slane %v256_v39, 1  ;;  %v308_v35 = vunpack.c.l.bf16 %v3313_v11  ;;  %v4889_v39 = vld [vmem:[%s4671_s20 + $0xe0] sm:$0xf] }
  0x35   : > { %4025 = vmatpush3.bf16.msra.mxu0 %v4438_v44  ;;  %4017 = vmatmul.mubr.bf16.gmra.mxu1 %v3330_v55  ;;  %v255_v44 = vunpack.c.l.bf16 %v237_v30  ;;  %v298_v55 = vunpack.c.l.bf16 %v4790_v61  ;;  %v628_v61 = vrot.slane %v253_v43, 1  ;;  %v3304_v30 = vld [vmem:[%s4671_s20 + $0x94] sm:$0x1]  ;;  %v324_v52 = vunpack.c.l.bf16 %v4889_v39 }
  0x36   : > { %4049 = vmatpush3.bf16.msra.mxu1 %v4439_v51  ;;  %4026 = vmatprep.subr.bf16.mxu0 %v4440_v59  ;;  %v627_v51 = vrot.slane %v252_v28, 1  ;;  %v4883_v28 = vld [vmem:[%s4671_s20 + $0xd8] sm:$0xf] }
  0x37   : > { %4050 = vmatprep.subr.bf16.mxu1 %v4441_v0  ;;  %4060 = vmatprep.mubr.bf16.mxu1 %v3391_v2  ;;  %v631_v62 = vrot.slane %v255_v44, 1  ;;  %v4856_v2 = vsel %vm614_vm0, %v624_v33, %v625_v50  ;;  %v3306_v33 = vld [vmem:[%s4671_s20 + $0x9c] sm:$0x1]  ;;  %v4461_v44 = vld [vmem:[%s5771_s1 + $0x170] sm:$0xff]  }
  0x38   : > { %4036 = vmatprep.mubr.bf16.mxu0 %v647_v10  ;;  %5791 = vst [vmem:[#allocation5_spill] sm:$0xff] %v4856_v2  ;;  %v637_v10 = vrot.slane %v259_v49, 1  ;;  %v4872_v17 = vsel %vm614_vm0, %v627_v51, %v628_v61  ;;  %v301_v43 = vunpack.c.l.bf16 %v3306_v33  ;;  %v323_v51 = vunpack.c.l.bf16 %v4883_v28  ;;  %v4462_v61 = vld [vmem:[%s5771_s1 + $0x128] sm:$0xff]   ;;  %v3316_v33 = vld [vmem:[%s4671_s20 + $0xc4] sm:$0x1] }
  0x39   : > { %4027 = vmatpush3.bf16.msra.mxu0 %v4440_v59  ;;  %v257_v59 = vunpack.c.l.bf16 %v239_v41  ;;  %5792 = vst [vmem:[#allocation6_spill] sm:$0xff] %v4872_v17  ;;  %v299_v41 = vunpack.c.l.bf16 %v3304_v30  ;;  %v3314_v30 = vld [vmem:[%s4671_s20 + $0xbc] sm:$0x1]  ;;  %v1554_v42 = vpack.c.bf16 %v4872_v17, %v4856_v2 }
  0x3a   : > { %4051 = vmatpush3.bf16.msra.mxu1 %v4441_v0  ;;  %4028 = vmatprep.subr.bf16.mxu0 %v4442_v5  ;;  %v4850_v0 = vld [vmem:[%s4671_s20 + $0xa8] sm:$0xf]  ;;  %v4905_v49 = vsel %vm614_vm0, %v636_v3, %v637_v10 }
  0x3b   : > { %4052 = vmatprep.subr.bf16.mxu1 %v4447_v9  ;;  %v3392_v24 = vcombine.low %v4847_v63, %v4850_v0  ;;  %5795 = vst [vmem:[#allocation9_spill] sm:$0xff] %v4905_v49 }
  0x3d   : > { %4029 = vmatpush3.bf16.msra.mxu0 %v4442_v5  ;;  %v1089_v5 = vrot.slane %v298_v55, 1  ;;  %v1093_v55 = vrot.slane %v301_v43, 1 }
  0x3e   : > { %4053 = vmatpush3.bf16.msra.mxu1 %v4447_v9  ;;  %4030 = vmatprep.subr.bf16.mxu0 %v4450_v14  ;;  %v634_v9 = vrot.slane %v257_v59, 1 }
  0x3f   : > { %4054 = vmatprep.subr.bf16.mxu1 %v4451_v18  ;;  %v1094_v3 = vsel %vm614_vm0, %v1092_v7, %v1093_v55  ;;  %v3312_v7 = vld [vmem:[%s4671_s20 + $0xb4] sm:$0x1] }
  0x40   : > { %v4902_v59 = vsel %vm614_vm0, %v633_v57, %v634_v9  ;;  %v4465_v57 = vld [vmem:[%s5771_s1 + $0x168] sm:$0xff]  }
  0x41   : > { %4031 = vmatpush3.bf16.msra.mxu0 %v4450_v14  ;;  %v648_v14 = vpack.c.bf16 %v4856_v2, %v4853_v1  ;;  %5794 = vst [vmem:[#allocation8_spill] sm:$0xff] %v4902_v59 }
  0x42   : > { %4055 = vmatpush3.bf16.msra.mxu1 %v4451_v18  ;;  %4032 = vmatprep.subr.bf16.mxu0 %v4452_v21  ;;  %v4875_v18 = vsel %vm614_vm0, %v630_v53, %v631_v62  ;;  %v3393_v53 = vcombine.low %v3311_v8, %v3313_v11  ;;  %v1101_v62 = vrot.slane %v306_v25, 1  ;;  %v1104_v8 = vrot.slane %v308_v35, 1  ;;  %v4921_v25 = vld [vmem:[%s4671_s20 + $0xf8] sm:$0xf] }
  0x43   : > { %4056 = vmatprep.subr.bf16.mxu1 %v4453_v36  ;;  %5793 = vst [vmem:[#allocation7_spill] sm:$0xff] %v4875_v18  ;;  %v649_v45 = vpack.c.bf16 %v4875_v18, %v4872_v17  ;;  %v1772_v11 = vadd.f32 %v1094_v3, %v324_v52  ;;  %v309_v52 = vunpack.c.l.bf16 %v3314_v30 }
  0x45   : > { %4033 = vmatpush3.bf16.msra.mxu0 %v4452_v21  ;;  %v4878_v21 = vld [vmem:[%s4671_s20 + $0xc8] sm:$0xf] }
  0x46   : > { %4057 = vmatpush3.bf16.msra.mxu1 %v4453_v36  ;;  %4034 = vmatprep.subr.bf16.mxu0 %v4454_v54  ;;  %v310_v36 = vunpack.c.l.bf16 %v4864_v13  ;;  %v312_v50 = vunpack.c.l.bf16 %v4878_v21  ;;  %v3394_v35 = vcombine.low %v4864_v13, %v4878_v21  ;;  %v4467_v13 = vld [vmem:[%s5771_s1 + $0x160] sm:$0xff]  }
  0x47   : > { %4058 = vmatprep.subr.bf16.mxu1 %v4455_v58 }
  0x48   : > { %v1110_v9 = vrot.slane %v312_v50, 1  ;;  %v4939_v50 = vld [vmem:[%s4671_s20 + $0x108] sm:$0xf] }
  0x49   : > { %4035 = vmatpush3.bf16.msra.mxu0 %v4454_v54  ;;  %v1090_v54 = vrot.slane %v299_v41, 1 }
  0x4a   : > { %4059 = vmatpush3.bf16.msra.mxu1 %v4455_v58  ;;  %4068 = vmatprep.subr.bf16.mxu0 %v4456_v60  ;;  %v274_v58 = vunpack.c.l.bf16 %v4696_v19  ;;  %v4495_v19 = vld [vmem:[%s5771_s1 + $0x1c0] sm:$0xff]  }
  0x4b   : > { %4092 = vmatprep.subr.bf16.mxu1 %v4459_v4 }
  0x4c   : > { %4037 = vmatmul.mubr.bf16.vlgmr.msra.gmra.mxu0 %v648_v14  ;;  %v650_v14 = vpack.c.bf16 %v4905_v49, %v4902_v59  ;;  %v4935_v43 = vadd.f32 %v1772_v11, %v274_v58  ;;  %v277_v11 = vunpack.c.l.bf16 %v4730_v31  ;;  %v4506_v31 = vld [vmem:[%s5771_s1 + $0x218] sm:$0xff]  }
  0x4d   : > { %4069 = vmatpush3.bf16.msra.mxu0 %v4456_v60  ;;  %4061 = vmatmul.mubr.bf16.vlgmr.msra.gmra.mxu1 %v3392_v24  ;;  %v1091_v60 = vsel %vm614_vm0, %v1089_v5, %v1090_v54  ;;  %v4466_v24 = vld [vmem:[%s5771_s1 + $0x120] sm:$0xff]   ;;  %v329_v54 = vunpack.c.l.bf16 %v4939_v50 }
  0x4e   : > { %4093 = vmatpush3.bf16.msra.mxu1 %v4459_v4  ;;  %4070 = vmatprep.subr.bf16.mxu0 %v4460_v15  ;;  %v1107_v4 = vrot.slane %v310_v36, 1  ;;  %v1771_v10 = vadd.f32 %v1091_v60, %v323_v51  ;;  %v4924_v5 = vld [vmem:[%s4671_s20 + $0x100] sm:$0xf]  ;;  %v3419_v36 = vcombine.low %v4883_v28, %v4889_v39  ;;  %5797 = vst [vmem:[#allocation11_spill] sm:$0xff] %v4935_v43  ;;  %v307_v51 = vunpack.c.l.bf16 %v3312_v7 }
  0x4f   : > { %4094 = vmatprep.subr.bf16.mxu1 %v4461_v44  ;;  %4040 = vmatprep.mubr.bf16.mxu0 %v649_v45  ;;  %v3318_v45 = vld [vmem:[%s4671_s20 + $0xcc] sm:$0x1]  ;;  %v1121_v21 = vpack.c.bf16 %v1094_v3, %v1091_v60  ;;  %v327_v28 = vunpack.c.l.bf16 %v4921_v25  ;;  %v328_v39 = vunpack.c.l.bf16 %v4924_v5  ;;  %v278_v7 = vunpack.c.l.bf16 %v4753_v40  ;;  %v4509_v40 = vld [vmem:[%s5771_s1 + $0x200] sm:$0xff]  }
  0x50   : > { %4064 = vmatprep.mubr.bf16.mxu1 %v3393_v53  ;;  %v4933_v41 = vadd.f32 %v1771_v10, %v273_v56  ;;  %v311_v53 = vunpack.c.l.bf16 %v3316_v33  ;;  %v1102_v55 = vrot.slane %v307_v51, 1  ;;  %v1105_v56 = vrot.slane %v309_v52, 1 }
  0x51   : > { %4071 = vmatpush3.bf16.msra.mxu0 %v4460_v15  ;;  %v313_v15 = vunpack.c.l.bf16 %v3318_v45  ;;  %v279_v3 = vunpack.c.l.bf16 %v4771_v48 }
  0x52   : > { %5796 = vst [vmem:[#allocation10_spill] sm:$0xff] %v4933_v41  ;;  %4095 = vmatpush3.bf16.msra.mxu1 %v4461_v44  ;;  %4072 = vmatprep.subr.bf16.mxu0 %v4462_v61  ;;  %v4948_v44 = vld [vmem:[%s4671_s20 + $0x110] sm:$0xf]  ;;  %v1108_v58 = vrot.slane %v311_v53, 1  ;;  %v4958_v30 = vsel %vm614_vm0, %v1101_v62, %v1102_v55  ;;  %v4961_v33 = vsel %vm614_vm0, %v1104_v8, %v1105_v56  ;;  %v302_v53 = vunpack.c.l.bf16 %v4847_v63  ;;  %v4473_v63 = vld [vmem:[%s5771_s1 + $0x148] sm:$0xff]  }
  0x53   : > { %4096 = vmatprep.subr.bf16.mxu1 %v4465_v57  ;;  %v1111_v10 = vrot.slane %v313_v15, 1  ;;  %v330_v60 = vunpack.c.l.bf16 %v4948_v44  ;;  %v1775_v48 = vadd.f32 %v4958_v30, %v327_v28  ;;  %v4470_v62 = vld [vmem:[%s5771_s1 + $0x110] sm:$0xff]   ;;  %v4999_v55 = vld [vmem:[%s4671_s20 + $0x40] sm:$0xf]  ;;  %v5005_v56 = vld [vmem:[%s4671_s20 + $0x88] sm:$0xf] }
  0x54   : > { %4041 = vmatmul.mubr.bf16.gmra.mxu0 %v650_v14  ;;  %v4468_v14 = vld [vmem:[%s5771_s1 + $0x118] sm:$0xff]   ;;  %v1095_v28 = vrot.slane %v302_v53, 1  ;;  %v243_v53 = vld [vmem:[%s4671_s20 + $0x44] sm:$0x1]  ;;  %v3474_v34 = vcombine.low %v4582_v27, %v4999_v55 }
  0x55   : > { %4073 = vmatpush3.bf16.msra.mxu0 %v4462_v61  ;;  %4065 = vmatmul.mubr.bf16.gmra.mxu1 %v3394_v35  ;;  %v4469_v61 = vld [vmem:[%s5771_s1 + $0x158] sm:$0xff]   ;;  %v4969_v35 = vsel %vm614_vm0, %v1107_v4, %v1108_v58  ;;  %v4975_v8 = vsel %vm614_vm0, %v1110_v9, %v1111_v10  ;;  %v4981_v51 = vadd.f32 %v1775_v48, %v277_v11  ;;  %v3308_v9 = vld [vmem:[%s4671_s20 + $0xa4] sm:$0x1]  ;;  %v260_v11 = vunpack.c.l.bf16 %v4999_v55 }
  0x56   : > { %4097 = vmatpush3.bf16.msra.mxu1 %v4465_v57  ;;  %4074 = vmatprep.subr.bf16.mxu0 %v4466_v24  ;;  %v1776_v57 = vadd.f32 %v4961_v33, %v328_v39  ;;  %v1777_v45 = vadd.f32 %v4969_v35, %v329_v54  ;;  %v1778_v52 = vadd.f32 %v4975_v8, %v330_v60  ;;  %v4472_v39 = vld [vmem:[%s5771_s1 + $0x108] sm:$0xff]   ;;  %v4475_v10 = vld [vmem:[%s5771_s1 + $0x140] sm:$0xff]   ;;  %v4510_v55 = vld [vmem:[%s5773_s3 + $0x38] sm:$0xff]  }
  0x57   : > { %4098 = vmatprep.subr.bf16.mxu1 %v4467_v13  ;;  %4084 = vmatprep.mubr.bf16.mxu0 %v3419_v36  ;;  %v4471_v36 = vld [vmem:[%s5771_s1 + $0x150] sm:$0xff]   ;;  %5798 = vst [vmem:[#allocation12_spill] sm:$0xff] %v4981_v51 }
  0x58   : > { %4108 = vmatprep.mubr.bf16.mxu1 %v1121_v21  ;;  %v4983_v4 = vadd.f32 %v1776_v57, %v278_v7  ;;  %v4988_v15 = vadd.f32 %v1777_v45, %v279_v3  ;;  %v304_v21 = vunpack.c.l.bf16 %v4850_v0  ;;  %v4474_v0 = vld [vmem:[%s5771_s1 + $0x100] sm:$0xff]   ;;  %v280_v7 = vunpack.c.l.bf16 %v5005_v56  ;;  %v4478_v57 = vld [vmem:[%s5771_s1 + $0x1b8] sm:$0xff]  }
  0x59   : > { %4075 = vmatpush3.bf16.msra.mxu0 %v4466_v24  ;;  %v3310_v24 = vld [vmem:[%s4671_s20 + $0xac] sm:$0x1]  ;;  %v1549_v45 = vrot.slane %v260_v11, 1  ;;  %v1123_v11 = vpack.c.bf16 %v4961_v33, %v4958_v30  ;;  %v1124_v30 = vpack.c.bf16 %v4975_v8, %v4969_v35  ;;  %v4487_v33 = vld [vmem:[%s5771_s1 + $0x1e0] sm:$0xff]   ;;  %v4490_v35 = vld [vmem:[%s5771_s1 + $0x190] sm:$0xff]  }
  0x5a   : > { %5799 = vst [vmem:[#allocation13_spill] sm:$0xff] %v4983_v4  ;;  %4099 = vmatpush3.bf16.msra.mxu1 %v4467_v13  ;;  %4076 = vmatprep.subr.bf16.mxu0 %v4468_v14  ;;  %5800 = vst [vmem:[#allocation14_spill] sm:$0xff] %v4988_v15  ;;  %v303_v13 = vunpack.c.l.bf16 %v3308_v9  ;;  %v305_v54 = vunpack.c.l.bf16 %v3310_v24  ;;  %v1098_v58 = vrot.slane %v304_v21, 1  ;;  %v1786_v48 = vadd.f32 %v1778_v52, %v280_v7  ;;  %v4480_v21 = vld [vmem:[%s5771_s1 + $0x1b0] sm:$0xff]   ;;  %v4502_v7 = vld [vmem:[%s5771_s1 + $0x228] sm:$0xff]  }
  0x5b   : > { %4100 = vmatprep.subr.bf16.mxu1 %v4469_v61  ;;  %v261_v52 = vunpack.c.l.bf16 %v243_v53  ;;  %v4491_v8 = vld [vmem:[%s5771_s1 + $0x1d0] sm:$0xff]   ;;  %v5776_v53 = vmov 0.0  }
  0x5c   : > { %v1096_v60 = vrot.slane %v303_v13, 1  ;;  %v1099_v3 = vrot.slane %v305_v54, 1  ;;  %v3421_v54 = vcombine.low %v4921_v25, %v4924_v5  ;;  %v3422_v25 = vcombine.low %v4939_v50, %v4948_v44  ;;  %v4486_v5 = vld [vmem:[%s5771_s1 + $0x1a0] sm:$0xff]   ;;  %v4488_v50 = vld [vmem:[%s5771_s1 + $0x198] sm:$0xff]   ;;  %1740 = vst [vmem:[#allocation2 + $0x30] sm:$0xff] %v5776_v53  ;;  %1736 = vst [vmem:[#allocation2 + $0x10] sm:$0xff] %v5776_v53 }
  0x5d   : > { %4077 = vmatpush3.bf16.msra.mxu0 %v4468_v14  ;;  %v3321_v14 = vld [vmem:[%s4671_s20 + $0xe8] sm:$0xf]  ;;  %v4489_v44 = vld [vmem:[%s5771_s1 + $0x1d8] sm:$0xff]   ;;  %1741 = vst [vmem:[#allocation2 + $0x38] sm:$0x3] %v5776_v53  ;;  %1738 = vst [vmem:[#allocation2 + $0x20] sm:$0xff] %v5776_v53 }
  0x5e   : > { %4101 = vmatpush3.bf16.msra.mxu1 %v4469_v61  ;;  %4078 = vmatprep.subr.bf16.mxu0 %v4470_v62  ;;  %v3322_v61 = vld [vmem:[%s4671_s20 + $0xf0] sm:$0xf]  ;;  %v5025_v9 = vsel %vm614_vm0, %v1098_v58, %v1099_v3  ;;  %1735 = vst [vmem:[#allocation2 + $0x8] sm:$0x3] %v5776_v53  ;;  %1737 = vst [vmem:[#allocation2 + $0x18] sm:$0x3] %v5776_v53 }
  0x5f   : > { %4102 = vmatprep.subr.bf16.mxu1 %v4471_v36  ;;  %5802 = vst [vmem:[#allocation16_spill] sm:$0xff] %v5025_v9  ;;  %v3420_v24 = vcombine.low %v3321_v14, %v3322_v61  ;;  %v4512_v3 = vld [vmem:[%s5773_s3 + $0x30] sm:$0xff]   ;;  %v4514_v61 = vld [vmem:[%s5773_s3 + $0x28] sm:$0xff]   ;;  %1739 = vst [vmem:[#allocation2 + $0x28] sm:$0x3] %v5776_v53 }
  0x60   : > { %v4513_v14 = vld [vmem:[%s5773_s3 + $0x70] sm:$0xff]   ;;  %1742 = vst [vmem:[#allocation2 + $0x40] sm:$0xff] %v5776_v53  ;;  %1743 = vst [vmem:[#allocation2 + $0x48] sm:$0x3] %v5776_v53 }
  0x61   : > { %4079 = vmatpush3.bf16.msra.mxu0 %v4470_v62  ;;  %v4479_v62 = vld [vmem:[%s5771_s1 + $0x1f8] sm:$0xff]   ;;  %1744 = vst [vmem:[#allocation2 + $0x50] sm:$0xff] %v5776_v53  ;;  %1745 = vst [vmem:[#allocation2 + $0x58] sm:$0x3] %v5776_v53 }
  0x62   : > { %4103 = vmatpush3.bf16.msra.mxu1 %v4471_v36  ;;  %4080 = vmatprep.subr.bf16.mxu0 %v4472_v39  ;;  %v5022_v36 = vsel %vm614_vm0, %v1095_v28, %v1096_v60  ;;  %v4481_v28 = vld [vmem:[%s5771_s1 + $0x1f0] sm:$0xff]   ;;  %v4583_v60 = vld [vmem:[%s4671_s20 + $0x80] sm:$0xf]  ;;  %1746 = vst [vmem:[#allocation2 + $0x60] sm:$0xff] %v5776_v53  ;;  %1747 = vst [vmem:[#allocation2 + $0x68] sm:$0x3] %v5776_v53 }
  0x63   : > { %4104 = vmatprep.subr.bf16.mxu1 %v4473_v63  ;;  %5801 = vst [vmem:[#allocation15_spill] sm:$0xff] %v5022_v36  ;;  %v1122_v13 = vpack.c.bf16 %v5025_v9, %v5022_v36  ;;  %v3502_v26 = vcombine.low %v4583_v60, %v5005_v56  ;;  %v4511_v56 = vld [vmem:[%s5773_s3 + $0x78] sm:$0xff]   ;;  %1748 = vst [vmem:[#allocation2 + $0x70] sm:$0xff] %v5776_v53 }
  0x64   : > { %1749 = vst [vmem:[#allocation2 + $0x78] sm:$0x3] %v5776_v53  ;;  %1750 = vst [vmem:[#allocation2 + $0x80] sm:$0xff] %v5776_v53 }
  0x65   : > { %4081 = vmatpush3.bf16.msra.mxu0 %v4472_v39  ;;  %v1550_v39 = vrot.slane %v261_v52, 1  ;;  %1751 = vst [vmem:[#allocation2 + $0x88] sm:$0x3] %v5776_v53  ;;  %1753 = vst [vmem:[#allocation2 + $0x98] sm:$0x3] %v5776_v53  ;;  %v4519_v52 = vld [vmem:[%s5773_s3 + $0x58] sm:$0xff]  }
  0x66   : > { %4105 = vmatpush3.bf16.msra.mxu1 %v4473_v63  ;;  %4082 = vmatprep.subr.bf16.mxu0 %v4474_v0 }
  0x67   : > { %4106 = vmatprep.subr.bf16.mxu1 %v4475_v10  ;;  %v5036_v63 = vsel %vm614_vm0, %v1549_v45, %v1550_v39  ;;  %v4518_v45 = vld [vmem:[%s5773_s3 + $0x18] sm:$0xff]   ;;  %v4521_v39 = vld [vmem:[%s5773_s3 + $0x50] sm:$0xff]  }
  0x68   : > { %v5041_v58 = vadd.f32 %v1786_v48, %v5036_v63  ;;  %v4515_v48 = vld [vmem:[%s5773_s3 + $0x68] sm:$0xff]  }
  0x69   : > { %4083 = vmatpush3.bf16.msra.mxu0 %v4474_v0  ;;  %v4484_v0 = vld [vmem:[%s5771_s1 + $0x1a8] sm:$0xff]  }
  0x6a   : > { %4107 = vmatpush3.bf16.msra.mxu1 %v4475_v10  ;;  %4116 = vmatprep.subr.bf16.mxu0 %v4478_v57  ;;  %5803 = vst [vmem:[#allocation17_spill] sm:$0xff] %v5041_v58  ;;  %v4485_v10 = vld [vmem:[%s5771_s1 + $0x1e8] sm:$0xff]  }
  0x6b   : > { %4140 = vmatprep.subr.bf16.mxu1 %v4479_v62 }
  0x6c   : > { %4085 = vmatmul.mubr.bf16.vlgmr.msra.gmra.mxu0 %v3420_v24 }
  0x6d   : > { %4117 = vmatpush3.bf16.msra.mxu0 %v4478_v57  ;;  %4109 = vmatmul.mubr.bf16.vlgmr.msra.gmra.mxu1 %v1122_v13  ;;  %v4516_v57 = vld [vmem:[%s5773_s3 + $0x20] sm:$0xff]  }
  0x6e   : > { %4141 = vmatpush3.bf16.msra.mxu1 %v4479_v62  ;;  %4118 = vmatprep.subr.bf16.mxu0 %v4480_v21  ;;  %v4517_v62 = vld [vmem:[%s5773_s3 + $0x60] sm:$0xff]  }
  0x6f   : > { %4142 = vmatprep.subr.bf16.mxu1 %v4481_v28  ;;  %4088 = vmatprep.mubr.bf16.mxu0 %v3421_v54 }
  0x70   : > { %4112 = vmatprep.mubr.bf16.mxu1 %v1123_v11  ;;  %v4525_v11 = vld [vmem:[%s5773_s3 + $0x40] sm:$0xff]  }
  0x71   : > { %4119 = vmatpush3.bf16.msra.mxu0 %v4480_v21  ;;  %v4520_v21 = vld [vmem:[%s5773_s3 + $0x10] sm:$0xff]  }
  0x72   : > { %4143 = vmatpush3.bf16.msra.mxu1 %v4481_v28  ;;  %4120 = vmatprep.subr.bf16.mxu0 %v4484_v0  ;;  %v4522_v28 = vld [vmem:[%s5773_s3 + $0x8] sm:$0xff]  }
  0x73   : > { %4144 = vmatprep.subr.bf16.mxu1 %v4485_v10 }
  0x74   : > { %4089 = vmatmul.mubr.bf16.gmra.mxu0 %v3422_v25  ;;  %v5216_v25 = vld [vmem:[%s5773_s3 + $0xf8] sm:$0xff]  }
  0x75   : > { %4121 = vmatpush3.bf16.msra.mxu0 %v4484_v0  ;;  %4113 = vmatmul.mubr.bf16.gmra.mxu1 %v1124_v30  ;;  %v4524_v0 = vld [vmem:[%s5773_s3] sm:$0xff]   ;;  %5804 = vst [vmem:[#allocation18_spill] sm:$0xff] %v5216_v25 }
  0x76   : > { %4145 = vmatpush3.bf16.msra.mxu1 %v4485_v10  ;;  %4122 = vmatprep.subr.bf16.mxu0 %v4486_v5 }
  0x77   : > { %4146 = vmatprep.subr.bf16.mxu1 %v4487_v33  ;;  %4132 = vmatprep.mubr.bf16.mxu0 %v3471_v22  ;;  %v4497_v22 = vld [vmem:[%s5771_s1 + $0x238] sm:$0xff]  }
  0x78   : > { %4156 = vmatprep.mubr.bf16.mxu1 %v3499_v23  ;;  %v4499_v23 = vld [vmem:[%s5771_s1 + $0x230] sm:$0xff]  }
  0x79   : > { %4123 = vmatpush3.bf16.msra.mxu0 %v4486_v5 }
  0x7a   : > { %4147 = vmatpush3.bf16.msra.mxu1 %v4487_v33  ;;  %4124 = vmatprep.subr.bf16.mxu0 %v4488_v50  ;;  %v5222_v33 = vld [vmem:[%s5773_s3 + $0xb8] sm:$0xff]  }
  0x7b   : > { %4148 = vmatprep.subr.bf16.mxu1 %v4489_v44  ;;  %5805 = vst [vmem:[#allocation19_spill] sm:$0xff] %v5222_v33 }
  0x7d   : > { %4125 = vmatpush3.bf16.msra.mxu0 %v4488_v50 }
  0x7e   : > { %4149 = vmatpush3.bf16.msra.mxu1 %v4489_v44  ;;  %4126 = vmatprep.subr.bf16.mxu0 %v4490_v35 }
  0x7f   : > { %4150 = vmatprep.subr.bf16.mxu1 %v4491_v8 }
  0x81   : > { %4127 = vmatpush3.bf16.msra.mxu0 %v4490_v35 }
  0x82   : > { %4151 = vmatpush3.bf16.msra.mxu1 %v4491_v8  ;;  %4128 = vmatprep.subr.bf16.mxu0 %v4492_v16 }
  0x83   : > { %4152 = vmatprep.subr.bf16.mxu1 %v4493_v20 }
  0x85   : > { %4129 = vmatpush3.bf16.msra.mxu0 %v4492_v16 }
  0x86   : > { %4153 = vmatpush3.bf16.msra.mxu1 %v4493_v20  ;;  %4130 = vmatprep.subr.bf16.mxu0 %v4494_v12 }
  0x87   : > { %4154 = vmatprep.subr.bf16.mxu1 %v4495_v19 }
  0x89   : > { %4131 = vmatpush3.bf16.msra.mxu0 %v4494_v12 }
  0x8a   : > { %4155 = vmatpush3.bf16.msra.mxu1 %v4495_v19  ;;  %4164 = vmatprep.subr.bf16.mxu0 %v4497_v22 }
  0x8b   : > { %4188 = vmatprep.subr.bf16.mxu1 %v4511_v56 }
  0x8c   : > { %4133 = vmatmul.mubr.bf16.vlgmr.msra.gmra.mxu0 %v3472_v38  ;;  %v4505_v38 = vld [vmem:[%s5771_s1 + $0x220] sm:$0xff]  }
  0x8d   : > { %4165 = vmatpush3.bf16.msra.mxu0 %v4497_v22  ;;  %4157 = vmatmul.mubr.bf16.vlgmr.msra.gmra.mxu1 %v3500_v32  ;;  %v4507_v32 = vld [vmem:[%s5771_s1 + $0x210] sm:$0xff]  }
  0x8e   : > { %4166 = vmatprep.subr.bf16.mxu0 %v4499_v23  ;;  %4136 = vmatprep.mubr.bf16.mxu0 %v3473_v46  ;;  %v1555_v46 = vpack.c.bf16 %v4902_v59, %v4875_v18 }
  0x8f   : > { %4160 = vmatprep.mubr.bf16.mxu1 %v3501_v47  ;;  %v1556_v47 = vpack.c.bf16 %v5036_v63, %v4905_v49  ;;  %4189 = vmatpush3.bf16.msra.mxu1 %v4511_v56  ;;  %v4523_v63 = vld [vmem:[%s5773_s3 + $0x48] sm:$0xff]  }
  0x90   : > { %4190 = vmatprep.subr.bf16.mxu1 %v4513_v14 }
  0x91   : > { %4167 = vmatpush3.bf16.msra.mxu0 %v4499_v23 }
  0x92   : > { %4168 = vmatprep.subr.bf16.mxu0 %v4502_v7 }
  0x93   : > { %4191 = vmatpush3.bf16.msra.mxu1 %v4513_v14 }
  0x94   : > { %4137 = vmatmul.mubr.bf16.gmra.mxu0 %v3474_v34  ;;  %4192 = vmatprep.subr.bf16.mxu1 %v4515_v48 }
  0x95   : > { %4169 = vmatpush3.bf16.msra.mxu0 %v4502_v7  ;;  %4161 = vmatmul.mubr.bf16.gmra.mxu1 %v3502_v26 }
  0x96   : > { %4170 = vmatprep.subr.bf16.mxu0 %v4505_v38  ;;  %4180 = vmatprep.mubr.bf16.mxu0 %v1553_v29 }
  0x97   : > { %4193 = vmatpush3.bf16.msra.mxu1 %v4515_v48 }
  0x98   : > { %4194 = vmatprep.subr.bf16.mxu1 %v4517_v62 }
  0x99   : > { %4171 = vmatpush3.bf16.msra.mxu0 %v4505_v38 }
  0x9a   : > { %4172 = vmatprep.subr.bf16.mxu0 %v4506_v31 }
  0x9b   : > { %4195 = vmatpush3.bf16.msra.mxu1 %v4517_v62 }
  0x9c   : > { %4196 = vmatprep.subr.bf16.mxu1 %v4519_v52 }
  0x9d   : > { %4173 = vmatpush3.bf16.msra.mxu0 %v4506_v31 }
  0x9e   : > { %4174 = vmatprep.subr.bf16.mxu0 %v4507_v32 }
  0x9f   : > { %4197 = vmatpush3.bf16.msra.mxu1 %v4519_v52 }
  0xa0   : > { %4198 = vmatprep.subr.bf16.mxu1 %v4521_v39 }
  0xa1   : > { %4175 = vmatpush3.bf16.msra.mxu0 %v4507_v32 }
  0xa2   : > { %4176 = vmatprep.subr.bf16.mxu0 %v4508_v37 }
  0xa3   : > { %4199 = vmatpush3.bf16.msra.mxu1 %v4521_v39 }
  0xa4   : > { %4200 = vmatprep.subr.bf16.mxu1 %v4523_v63 }
  0xa5   : > { %4177 = vmatpush3.bf16.msra.mxu0 %v4508_v37 }
  0xa6   : > { %4178 = vmatprep.subr.bf16.mxu0 %v4509_v40 }
  0xa7   : > { %4201 = vmatpush3.bf16.msra.mxu1 %v4523_v63 }
  0xa8   : > { %4202 = vmatprep.subr.bf16.mxu1 %v4525_v11 }
  0xa9   : > { %4179 = vmatpush3.bf16.msra.mxu0 %v4509_v40 }
  0xaa   : > { %4212 = vmatprep.subr.bf16.mxu0 %v4510_v55 }
  0xab   : > { %4203 = vmatpush3.bf16.msra.mxu1 %v4525_v11 }
  0xac   : > { %4181 = vmatmul.mubr.bf16.vlgmr.msra.gmra.mxu0 %v1554_v42  ;;  %4236 = vmatprep.subr.bf16.mxu1 %v5222_v33 }
  0xad   : > { %4184 = vmatprep.mubr.bf16.mxu0 %v1555_v46  ;;  %4213 = vmatpush3.bf16.msra.mxu0 %v4510_v55 }
  0xae   : > { %4214 = vmatprep.subr.bf16.mxu0 %v4512_v3 }
  0xb1   : > { %4215 = vmatpush3.bf16.msra.mxu0 %v4512_v3 }
  0xb2   : > { %4216 = vmatprep.subr.bf16.mxu0 %v4514_v61 }
  0xb4   : > { %4185 = vmatmul.mubr.bf16.gmra.mxu0 %v1556_v47 }
  0xb5   : > { %4217 = vmatpush3.bf16.msra.mxu0 %v4514_v61 }
  0xb6   : > { %4218 = vmatprep.subr.bf16.mxu0 %v4516_v57 }
  0xb9   : > { %4219 = vmatpush3.bf16.msra.mxu0 %v4516_v57 }
  0xba   : > { %4220 = vmatprep.subr.bf16.mxu0 %v4518_v45 }
  0xbd   : > { %4221 = vmatpush3.bf16.msra.mxu0 %v4518_v45 }
  0xbe   : > { %4222 = vmatprep.subr.bf16.mxu0 %v4520_v21 }
  0xc1   : > { %4223 = vmatpush3.bf16.msra.mxu0 %v4520_v21 }
  0xc2   : > { %4224 = vmatprep.subr.bf16.mxu0 %v4522_v28 }
  0xc5   : > { %4225 = vmatpush3.bf16.msra.mxu0 %v4522_v28 }
  0xc6   : > { %4226 = vmatprep.subr.bf16.mxu0 %v4524_v0 }
  0xc9   : > { %4227 = vmatpush3.bf16.msra.mxu0 %v4524_v0 }
  0xca   : > { %4260 = vmatprep.subr.bf16.mxu0 %v5216_v25 }
  0xec   : > { %v5187_v24 = vpop.f32.mrf.mxu0 }
  0xed   : > { %v4014_v5 = vpop.f32.mrf.mxu1 }
  0xee   : > { %v5195_v13 = vpop.f32.mrf.mxu0  ;;  %v576_v51 = vadd.f32 %v4014_v5, %v5187_v24 }
  0xef   : > { %v567_v50 = vpop.f32.mrf.mxu1 }
  0xf0   : > { %v5203_v54 = vpop.f32.mrf.mxu0  ;;  %v568_v49 = vadd.f32 %v567_v50, %v5195_v13 }
  0xf1   : > { %v4015_v35 = vpop.f32.mrf.mxu1 }
  0xf2   : > { %v5211_v10 = vpop.f32.mrf.mxu0  ;;  %v579_v17 = vadd.f32 %v4015_v35, %v5203_v54 }
  0xf3   : > { %v570_v16 = vpop.f32.mrf.mxu1 }
  0xf4   : > { %v3994_v30 = vpop.f32.mrf.mxu0  ;;  %v571_v33 = vadd.f32 %v570_v16, %v5211_v10 }
  0xf5   : > { %v4018_v12 = vpop.f32.mrf.mxu1 }
  0xf6   : > { %v470_v44 = vpop.f32.mrf.mxu0  ;;  %v592_v25 = vadd.f32 %v4018_v12, %v3994_v30 }
  0xf7   : > { %v583_v22 = vpop.f32.mrf.mxu1 }
  0xf8   : > { %v5225_v8 = vpop.f32.mrf.mxu0  ;;  %v584_v24 = vadd.f32 %v583_v22, %v470_v44 }
  0xf9   : > { %v4019_v7 = vpop.f32.mrf.mxu1 }
  0xfa   : > { %v5227_v20 = vpop.f32.mrf.mxu0  ;;  %v595_v50 = vadd.f32 %v4019_v7, %v5225_v8 }
  0xfb   : > { %v5229_v34 = vpop.f32.mrf.mxu1 }
 0x10c   : > { %v4038_v19 = vpop.f32.mrf.mxu0 }
 0x10d   : > { %v4062_v60 = vpop.f32.mrf.mxu1  ;;  %v783_v43 = vadd.f32 %v4038_v19, %v576_v51 }
 0x10e   : > { %v750_v23 = vpop.f32.mrf.mxu0 }
 0x10f   : > { %v892_v29 = vpop.f32.mrf.mxu1  ;;  %v781_v41 = vadd.f32 %v750_v23, %v568_v49  ;;  %v925_v2 = vadd.f32 %v4062_v60, %v783_v43 }
 0x110   : > { %v4039_v27 = vpop.f32.mrf.mxu0 }
 0x111   : > { %v4063_v32 = vpop.f32.mrf.mxu1  ;;  %v784_v9 = vadd.f32 %v4039_v27, %v579_v17 }
 0x112   : > { %v753_v38 = vpop.f32.mrf.mxu0 }
 0x113   : > { %v895_v40 = vpop.f32.mrf.mxu1  ;;  %v782_v5 = vadd.f32 %v753_v38, %v571_v33 }
 0x114   : > { %v4042_v26 = vpop.f32.mrf.mxu0 }
 0x115   : > { %v4066_v46 = vpop.f32.mrf.mxu1  ;;  %v924_v43 = vadd.f32 %v895_v40, %v782_v5 }
 0x116   : > { %v766_v31 = vpop.f32.mrf.mxu0 }
 0x117   : > { %v908_v55 = vpop.f32.mrf.mxu1  ;;  %v785_v54 = vadd.f32 %v766_v31, %v584_v24 }
 0x118   : > { %v4043_v37 = vpop.f32.mrf.mxu0 }
 0x119   : > { %v4067_v3 = vpop.f32.mrf.mxu1  ;;  %v788_v19 = vadd.f32 %v4043_v37, %v595_v50 }
 0x11a   : > { %v5231_v42 = vpop.f32.mrf.mxu0 }
 0x11b   : > { %5806 = vst [vmem:[#allocation20_spill] sm:$0xff] %v5231_v42  ;;  %v5233_v61 = vpop.f32.mrf.mxu1  ;;  %v926_v42 = vadd.f32 %v4063_v32, %v784_v9  ;;  %v930_v12 = vadd.f32 %v4067_v3, %v788_v19 }
 0x11c   : > { %5807 = vst [vmem:[#allocation21_spill] sm:$0xff] %v5233_v61 }
 0x122   : > { %v5811_v16 = vld [vmem:[#allocation20_spill] sm:$0xff] }
 0x12c   : > { %v4086_v47 = vpop.f32.mrf.mxu0 }
 0x12d   : > { %v4110_v57 = vpop.f32.mrf.mxu1 }
 0x12e   : > { %v1034_v56 = vpop.f32.mrf.mxu0 }
 0x12f   : > { %v1224_v45 = vpop.f32.mrf.mxu1 }
 0x130   : > { %v4087_v14 = vpop.f32.mrf.mxu0 }
 0x131   : > { %v4111_v21 = vpop.f32.mrf.mxu1  ;;  %v1068_v35 = vadd.f32 %v4087_v14, %v926_v42 }
 0x132   : > { %v1037_v48 = vpop.f32.mrf.mxu0 }
 0x133   : > { %v1227_v28 = vpop.f32.mrf.mxu1  ;;  %v1066_v33 = vadd.f32 %v1037_v48, %v924_v43 }
 0x134   : > { %v4090_v62 = vpop.f32.mrf.mxu0 }
 0x135   : > { %v4114_v0 = vpop.f32.mrf.mxu1  ;;  %v1256_v60 = vadd.f32 %v1227_v28, %v1066_v33 }
 0x136   : > { %v1050_v52 = vpop.f32.mrf.mxu0 }
 0x137   : > { %v1240_v53 = vpop.f32.mrf.mxu1 }
 0x138   : > { %v4091_v39 = vpop.f32.mrf.mxu0 }
 0x139   : > { %v5237_v4 = vpop.f32.mrf.mxu1 }
 0x13a   : > { %v5235_v63 = vpop.f32.mrf.mxu0  ;;  %5809 = vst [vmem:[#allocation23_spill] sm:$0xff] %v5237_v4  ;;  %v923_v4 = vadd.f32 %v892_v29, %v781_v41  ;;  %v1072_v29 = vadd.f32 %v4091_v39, %v930_v12 }
 0x13b   : > { %5808 = vst [vmem:[#allocation22_spill] sm:$0xff] %v5235_v63  ;;  %v5240_v18 = vpop.f32.mrf.mxu1  ;;  %v1067_v63 = vadd.f32 %v4086_v47, %v925_v2  ;;  %v587_v2 = vadd.f32 %v5229_v34, %v5227_v20  ;;  %v5252_v20 = vld [vmem:[%s5772_s2] ss:$0 sm:$0xff] }
 0x13c   : > { %5810 = vst [vmem:[#allocation24_spill] sm:$0xff] %v5240_v18  ;;  %v787_v18 = vadd.f32 %v4042_v26, %v592_v25  ;;  %v1065_v13 = vadd.f32 %v1034_v56, %v923_v4  ;;  %v927_v25 = vadd.f32 %v908_v55, %v785_v54  ;;  %v1258_v4 = vadd.f32 %v4111_v21, %v1068_v35  ;;  %v5261_v35 = vld [vmem:[#allocation2 + $0x8] sm:$0x3] }
 0x13d   : > { %v1257_v49 = vadd.f32 %v4110_v57, %v1067_v63  ;;  %v786_v8 = vadd.f32 %v5811_v16, %v587_v2 }
 0x13e   : > { %v929_v17 = vadd.f32 %v4066_v46, %v787_v18  ;;  %v1255_v10 = vadd.f32 %v1224_v45, %v1065_v13  ;;  %v1069_v22 = vadd.f32 %v1050_v52, %v927_v25 }
 0x140   : > { %v1071_v9 = vadd.f32 %v4090_v62, %v929_v17  ;;  %v1259_v40 = vadd.f32 %v1240_v53, %v1069_v22 }
 0x141   : > { %v5814_v48 = vld [vmem:[#allocation23_spill] sm:$0xff] }
 0x142   : > { %v1261_v26 = vadd.f32 %v4114_v0, %v1071_v9  ;;  %v5813_v3 = vld [vmem:[#allocation22_spill] sm:$0xff]  ;;  %v1262_v57 = vadd.f32 %v5814_v48, %v1072_v29  ;;  %v5816_v9 = vmov 0.0  }
 0x143   : > { %v5815_v24 = vld [vmem:[#allocation24_spill] sm:$0xff] }
 0x14c   : > { %v4134_v11 = vpop.f32.mrf.mxu0 }
 0x14d   : > { %v4158_v1 = vpop.f32.mrf.mxu1  ;;  %v1399_v30 = vadd.f32 %v4134_v11, %v1257_v49 }
 0x14e   : > { %v1366_v58 = vpop.f32.mrf.mxu0 }
 0x14f   : > { %v1508_v36 = vpop.f32.mrf.mxu1  ;;  %v1397_v44 = vadd.f32 %v1366_v58, %v1255_v10  ;;  %v1541_v27 = vadd.f32 %v4158_v1, %v1399_v30  ;;  %v5812_v58 = vld [vmem:[#allocation21_spill] sm:$0xff] }
 0x150   : > { %v4135_v59 = vpop.f32.mrf.mxu0  ;;  %v928_v37 = vadd.f32 %v5812_v58, %v786_v8 }
 0x151   : > { %v4159_v51 = vpop.f32.mrf.mxu1  ;;  %v1400_v18 = vadd.f32 %v4135_v59, %v1258_v4  ;;  %v1539_v34 = vadd.f32 %v1508_v36, %v1397_v44  ;;  %v5266_v4 = vrot.slane %v5816_v9, 1  ;;  %v1860_v44 = vrot.slane %v5261_v35, 1 }
 0x152   : > { %v1369_v15 = vpop.f32.mrf.mxu0  ;;  %v1070_v14 = vadd.f32 %v5813_v3, %v928_v37 }
 0x153   : > { %v1511_v41 = vpop.f32.mrf.mxu1  ;;  %v1398_v42 = vadd.f32 %v1369_v15, %v1256_v60  ;;  %v1542_v1 = vadd.f32 %v4159_v51, %v1400_v18  ;;  %v1861_v58 = vsel %vm614_vm0, %v5266_v4, %v1860_v44 }
 0x154   : > { %v4138_v6 = vpop.f32.mrf.mxu0  ;;  %v1260_v5 = vadd.f32 %v5815_v24, %v1070_v14 }
 0x155   : > { %v4162_v38 = vpop.f32.mrf.mxu1  ;;  %v1403_v46 = vadd.f32 %v4138_v6, %v1261_v26  ;;  %v1540_v53 = vadd.f32 %v1511_v41, %v1398_v42 }
 0x156   : > { %v1382_v61 = vpop.f32.mrf.mxu0 }
 0x157   : > { %v1524_v59 = vpop.f32.mrf.mxu1  ;;  %v1401_v62 = vadd.f32 %v1382_v61, %v1259_v40  ;;  %v1545_v15 = vadd.f32 %v4162_v38, %v1403_v46 }
 0x158   : > { %v4139_v23 = vpop.f32.mrf.mxu0 }
 0x159   : > { %v1404_v6 = vadd.f32 %v4139_v23, %v1262_v57  ;;  %v4163_v28 = vpop.f32.mrf.mxu1  ;;  %v1543_v13 = vadd.f32 %v1524_v59, %v1401_v62 }
 0x15a   : > { %v1385_v7 = vpop.f32.mrf.mxu0 }
 0x15b   : > { %v1402_v43 = vadd.f32 %v1385_v7, %v1260_v5  ;;  %v1546_v23 = vadd.f32 %v4163_v28, %v1404_v6  ;;  %v1527_v10 = vpop.f32.mrf.mxu1  ;;  %v5311_v28 = vld [vmem:[#allocation2 + $0x98] sm:$0x3] }
 0x15c   : > { %v5817_v5 = vld [vmem:[#allocation18_spill] sm:$0xff] }
 0x15d   : > { %v1544_v22 = vadd.f32 %v1527_v10, %v1402_v43  ;;  %v3034_v10 = vrot.slane %v5311_v28, 2 }
 0x16c   : > { %v4182_v31 = vpop.f32.mrf.mxu0 }
 0x16d   : > { %v1689_v32 = vadd.f32 %v4182_v31, %v1541_v27 }
 0x16e   : > { %v1656_v47 = vpop.f32.mrf.mxu0 }
 0x16f   : > { %v1704_v55 = vadd.f32 %v5252_v20, %v1689_v32  ;;  %v1687_v56 = vadd.f32 %v1656_v47, %v1539_v34 }
 0x170   : > { %v4183_v45 = vpop.f32.mrf.mxu0 }
 0x171   : > { %vm1712_vm1 = vcmp.gt.f32.partialorder %v1704_v55, 0.0  ;;  %v1720_v36 = vmul.f32 0.01, %v1704_v55  ;;  %v1702_v52 = vadd.f32 %v5252_v20, %v1687_v56  ;;  %v1690_v21 = vadd.f32 %v4183_v45, %v1542_v1 }
 0x172   : > { %v1659_v39 = vpop.f32.mrf.mxu0 }
 0x173   : > { %v1728_v63 = vsel %vm1712_vm1, %v1704_v55, %v1720_v36  ;;  %vm1710_vm2 = vcmp.gt.f32.partialorder %v1702_v52, 0.0  ;;  %v1718_v0 = vmul.f32 0.01, %v1702_v52  ;;  %v1705_v11 = vadd.f32 %v5252_v20, %v1690_v21 }
 0x174   : > { %1757 = vst [vmem:[#allocation2 + $0x31] sm:$0xff] %v1728_v63  ;;  %v1688_v61 = vadd.f32 %v1659_v39, %v1540_v53  ;;  %v4186_v51 = vpop.f32.mrf.mxu0 }
 0x175   : > { %v1726_v50 = vsel %vm1710_vm2, %v1702_v52, %v1718_v0  ;;  %vm1713_vm3 = vcmp.gt.f32.partialorder %v1705_v11, 0.0  ;;  %v1721_v54 = vmul.f32 0.01, %v1705_v11  ;;  %v1693_v49 = vadd.f32 %v4186_v51, %v1545_v15  ;;  %v4528_v15 = vld [vmem:[%s5773_s3 + $0xf0] sm:$0xff]  }
 0x176   : > { %1755 = vst [vmem:[#allocation2 + $0x11] sm:$0xff] %v1726_v50  ;;  %v1703_v17 = vadd.f32 %v5252_v20, %v1688_v61  ;;  %v1672_v19 = vpop.f32.mrf.mxu0  ;;  %v4529_v51 = vld [vmem:[%s5773_s3 + $0xb0] sm:$0xff]  }
 0x177   : > { %v1729_v30 = vsel %vm1713_vm3, %v1705_v11, %v1721_v54  ;;  %v1708_v41 = vadd.f32 %v5252_v20, %v1693_v49  ;;  %v1691_v2 = vadd.f32 %v1672_v19, %v1543_v13  ;;  %v4530_v19 = vld [vmem:[%s5773_s3 + $0xe8] sm:$0xff]  }
 0x178   : > { %1758 = vst [vmem:[#allocation2 + $0x41] sm:$0xff] %v1729_v30  ;;  %vm1711_vm4 = vcmp.gt.f32.partialorder %v1703_v17, 0.0  ;;  %v1719_v25 = vmul.f32 0.01, %v1703_v17  ;;  %v4187_v33 = vpop.f32.mrf.mxu0 }
 0x179   : > { %vm1716_vm5 = vcmp.gt.f32.partialorder %v1708_v41, 0.0  ;;  %v1724_v16 = vmul.f32 0.01, %v1708_v41  ;;  %v1706_v8 = vadd.f32 %v5252_v20, %v1691_v2  ;;  %v1694_v12 = vadd.f32 %v4187_v33, %v1546_v23  ;;  %v5818_v33 = vld [vmem:[#allocation19_spill] sm:$0xff] }
 0x17a   : > { %v1727_v7 = vsel %vm1711_vm4, %v1703_v17, %v1719_v25  ;;  %v1675_v27 = vpop.f32.mrf.mxu0  ;;  %v2139_v17 = vrot.slane %v5816_v9, 2  ;;  %v2140_v23 = vrot.slane %v5261_v35, 2 }
 0x17b   : > { %1756 = vst [vmem:[#allocation2 + $0x21] sm:$0xff] %v1727_v7  ;;  %v1732_v18 = vsel %vm1716_vm5, %v1708_v41, %v1724_v16  ;;  %vm1714_vm6 = vcmp.gt.f32.partialorder %v1706_v8, 0.0  ;;  %v1722_v38 = vmul.f32 0.01, %v1706_v8  ;;  %v1709_v60 = vadd.f32 %v5252_v20, %v1694_v12  ;;  %v5282_v47 = vld [vmem:[#allocation2 + $0x30] sm:$0xff] }
 0x17c   : > { %1761 = vst [vmem:[#allocation2 + $0x71] sm:$0xff] %v1732_v18  ;;  %v1692_v26 = vadd.f32 %v1675_v27, %v1544_v22  ;;  %v5284_v1 = vld [vmem:[#allocation2 + $0x38] sm:$0x3]  ;;  %v1868_v3 = vrot.slane %v5282_v47, 1  ;;  %v4531_v18 = vld [vmem:[%s5773_s3 + $0xa8] sm:$0xff]  }
 0x17d   : > { %v1730_v29 = vsel %vm1714_vm6, %v1706_v8, %v1722_v38  ;;  %vm1717_vm7 = vcmp.gt.f32.partialorder %v1709_v60, 0.0  ;;  %v1725_v31 = vmul.f32 0.01, %v1709_v60  ;;  %v5271_v34 = vld [vmem:[#allocation2 + $0x10] sm:$0xff]  ;;  %v5273_v32 = vld [vmem:[#allocation2 + $0x18] sm:$0x3] }
 0x17e   : > { %1759 = vst [vmem:[#allocation2 + $0x51] sm:$0xff] %v1730_v29  ;;  %v1707_v37 = vadd.f32 %v5252_v20, %v1692_v26  ;;  %v1823_v40 = vpack.c.bf16 %v5271_v34, %v5816_v9  ;;  %v1862_v42 = vrot.slane %v5271_v34, 1  ;;  %v1863_v46 = vrot.slane %v5273_v32, 1  ;;  %v4532_v26 = vld [vmem:[%s5773_s3 + $0xe0] sm:$0xff]  }
 0x17f   : > { %v1733_v59 = vsel %vm1717_vm7, %v1709_v60, %v1725_v31  ;;  %v1869_v14 = vrot.slane %v5284_v1, 1  ;;  %v5292_v48 = vld [vmem:[#allocation2 + $0x40] sm:$0xff]  ;;  %v5294_v57 = vld [vmem:[#allocation2 + $0x48] sm:$0x3]  ;;  %v2142_v2 = vrot.slane %v5271_v34, 2  ;;  %v2143_v25 = vrot.slane %v5273_v32, 2 }
 0x180   : > { %1762 = vst [vmem:[#allocation2 + $0x81] sm:$0xff] %v1733_v59  ;;  %vm1715_vm8 = vcmp.gt.f32.partialorder %v1707_v37, 0.0  ;;  %v1723_v55 = vmul.f32 0.01, %v1707_v37  ;;  %4228 = vmatprep.mubr.bf16.mxu0 %v1823_v40  ;;  %v5287_v56 = vsel %vm614_vm0, %v1862_v42, %v1863_v46  ;;  %v1871_v6 = vrot.slane %v5292_v48, 1  ;;  %v4533_v59 = vld [vmem:[%s5773_s3 + $0xa0] sm:$0xff]  }
 0x181   : > { %v1891_v20 = vpack.c.bf16 %v5287_v56, %v1861_v58  ;;  %v1872_v39 = vrot.slane %v5294_v57, 1  ;;  %v5318_v0 = vsel %vm614_vm0, %v1868_v3, %v1869_v14  ;;  %v2141_v31 = vsel %vm2138_vm9, %v2139_v17, %v2140_v23 }
 0x182   : > { %v1731_v62 = vsel %vm1715_vm8, %v1707_v37, %v1723_v55  ;;  %v5296_v45 = vld [vmem:[#allocation2 + $0x20] sm:$0xff]  ;;  %v5298_v36 = vld [vmem:[#allocation2 + $0x28] sm:$0x3]  ;;  %v5390_v32 = vsel %vm2138_vm9, %v2142_v2, %v2143_v25  ;;  %v5393_v58 = vsel %vm2138_vm9, %v2139_v17, %v3034_v10  ;;  %v2148_v23 = vrot.slane %v5282_v47, 2 }
 0x183   : > { %1760 = vst [vmem:[#allocation2 + $0x61] sm:$0xff] %v1731_v62  ;;  %4204 = vmatprep.mubr.bf16.mxu1 %v1891_v20  ;;  %v5302_v52 = vpack.c.bf16 %v5282_v47, %v5296_v45  ;;  %v1865_v21 = vrot.slane %v5296_v45, 1  ;;  %v1866_v53 = vrot.slane %v5298_v36, 1  ;;  %v5338_v49 = vld [vmem:[#allocation2 + $0x70] sm:$0xff]  ;;  %v5340_v43 = vld [vmem:[#allocation2 + $0x78] sm:$0x3]  ;;  %v5351_v30 = vsel %vm614_vm0, %v1871_v6, %v1872_v39 }
 0x184   : > { %v1880_v44 = vrot.slane %v5338_v49, 1  ;;  %v1881_v16 = vrot.slane %v5340_v43, 1  ;;  %v2313_v29 = vpack.c.bf16 %v5296_v45, %v5271_v34  ;;  %v2171_v55 = vpack.c.bf16 %v5390_v32, %v2141_v31  ;;  %v4534_v20 = vld [vmem:[%s5773_s3 + $0xd8] sm:$0xff]   ;;  %v4539_v6 = vld [vmem:[%s5773_s3 + $0x88] sm:$0xff]   ;;  %v4540_v39 = vld [vmem:[%s5773_s3 + $0xc0] sm:$0xff]  }
 0x185   : > { %4229 = vmatmul.mubr.bf16.vlgmr.msra.gmra.mxu0 %v5302_v52  ;;  %v5315_v63 = vsel %vm614_vm0, %v1865_v21, %v1866_v53  ;;  %v5320_v11 = vld [vmem:[#allocation2 + $0x50] sm:$0xff]  ;;  %v5322_v24 = vld [vmem:[#allocation2 + $0x58] sm:$0x3]  ;;  %v2149_v10 = vrot.slane %v5284_v1, 2  ;;  %v2151_v2 = vrot.slane %v5292_v48, 2  ;;  %v2152_v25 = vrot.slane %v5294_v57, 2 }
 0x186   : > { %4261 = vmatpush3.bf16.msra.mxu0 %v5817_v5  ;;  %v5327_v13 = vpack.c.bf16 %v5318_v0, %v5315_v63  ;;  %v5331_v61 = vpack.c.bf16 %v5320_v11, %v5292_v48  ;;  %v1874_v50 = vrot.slane %v5320_v11, 1  ;;  %v1875_v54 = vrot.slane %v5322_v24, 1  ;;  %v4535_v62 = vld [vmem:[%s5773_s3 + $0x98] sm:$0xff]   ;;  %v4536_v21 = vld [vmem:[%s5773_s3 + $0xd0] sm:$0xff]   ;;  %v4541_v5 = vld [vmem:[%s5773_s3 + $0x80] sm:$0xff]  }
 0x187   : > { %4262 = vmatprep.subr.bf16.mxu0 %v4528_v15  ;;  %v5365_v8 = vld [vmem:[#allocation2 + $0x80] sm:$0xff]  ;;  %v5371_v7 = vld [vmem:[#allocation2 + $0x88] sm:$0x3]  ;;  %v5400_v40 = vsel %vm614_vm0, %v1880_v44, %v1881_v16  ;;  %v4537_v53 = vld [vmem:[%s5773_s3 + $0x90] sm:$0xff]   ;;  %v2154_v17 = vrot.slane %v5320_v11, 2  ;;  %v5474_v57 = vsel %vm2138_vm9, %v2151_v2, %v2152_v25 }
 0x188   : > { %4205 = vmatmul.mubr.bf16.vlgmr.msra.gmra.mxu1 %v5327_v13  ;;  %4232 = vmatprep.mubr.bf16.mxu0 %v5331_v61  ;;  %v5354_v41 = vsel %vm614_vm0, %v1874_v50, %v1875_v54  ;;  %v2603_v42 = vrot.slane %v5365_v8, 2  ;;  %v2604_v34 = vrot.slane %v5371_v7, 2  ;;  %v2145_v50 = vrot.slane %v5296_v45, 2  ;;  %v4544_v1 = vld [vmem:[%s5773_s3 + $0x170] sm:$0xff]   ;;  %v4565_v25 = vld [vmem:[%s5773_s3 + $0x1a0] sm:$0xff]  }
 0x189   : > { %4237 = vmatpush3.bf16.msra.mxu1 %v5818_v33  ;;  %v5361_v35 = vpack.c.bf16 %v5354_v41, %v5351_v30  ;;  %v2146_v54 = vrot.slane %v5298_v36, 2  ;;  %v2314_v45 = vpack.c.bf16 %v5292_v48, %v5282_v47  ;;  %v5468_v47 = vsel %vm2138_vm9, %v2148_v23, %v2149_v10  ;;  %v4562_v23 = vld [vmem:[%s5773_s3 + $0x1e8] sm:$0xff]  }
 0x18a   : > { %4263 = vmatpush3.bf16.msra.mxu0 %v4528_v15  ;;  %4238 = vmatprep.subr.bf16.mxu1 %v4529_v51  ;;  %v5367_v12 = vld [vmem:[#allocation2 + $0x60] sm:$0xff]  ;;  %v5369_v22 = vld [vmem:[#allocation2 + $0x68] sm:$0x3]  ;;  %v5416_v3 = vsel %vm2138_vm9, %v2603_v42, %v2604_v34  ;;  %v2316_v31 = vpack.c.bf16 %v5365_v8, %v5338_v49  ;;  %v2457_v10 = vrot.slane %v5365_v8, 1  ;;  %v2458_v2 = vrot.slane %v5371_v7, 1 }
 0x18b   : > { %4208 = vmatprep.mubr.bf16.mxu1 %v5361_v35  ;;  %4264 = vmatprep.subr.bf16.mxu0 %v4530_v19  ;;  %v5376_v27 = vpack.c.bf16 %v5338_v49, %v5367_v12  ;;  %v1877_v38 = vrot.slane %v5367_v12, 1  ;;  %v1878_v60 = vrot.slane %v5369_v22, 1  ;;  %v3037_v14 = vpack.c.bf16 %v5393_v58, %v5416_v3  ;;  %v4538_v15 = vld [vmem:[%s5773_s3 + $0xc8] sm:$0xff]  }
 0x18c   : > { %v2147_v36 = vsel %vm2138_vm9, %v2145_v50, %v2146_v54  ;;  %v2315_v33 = vpack.c.bf16 %v5367_v12, %v5320_v11  ;;  %v4545_v11 = vld [vmem:[%s5773_s3 + $0x130] sm:$0xff]   ;;  %v2462_v54 = vpack.c.bf16 %v5351_v30, %v5318_v0  ;;  %v2459_v30 = vsel %vm614_vm0, %v2457_v10, %v2458_v2 }
 0x18d   : > { %4239 = vmatpush3.bf16.msra.mxu1 %v4529_v51  ;;  %4233 = vmatmul.mubr.bf16.gmra.mxu0 %v5376_v27  ;;  %v5397_v37 = vsel %vm614_vm0, %v1877_v38, %v1878_v60  ;;  %v4542_v51 = vld [vmem:[%s5773_s3 + $0x178] sm:$0xff]   ;;  %v5471_v48 = vpack.c.bf16 %v5468_v47, %v2147_v36  ;;  %v2157_v38 = vrot.slane %v5367_v12, 2  ;;  %v2158_v60 = vrot.slane %v5369_v22, 2  ;;  %v4547_v12 = vld [vmem:[%s5773_s3 + $0x128] sm:$0xff]   ;;  %v4548_v22 = vld [vmem:[%s5773_s3 + $0x160] sm:$0xff]  }
 0x18e   : > { %4265 = vmatpush3.bf16.msra.mxu0 %v4530_v19  ;;  %4276 = vmatprep.mubr.bf16.mxu0 %v2313_v29  ;;  %v5406_v46 = vpack.c.bf16 %v5400_v40, %v5397_v37  ;;  %v2155_v19 = vrot.slane %v5322_v24, 2  ;;  %v4543_v24 = vld [vmem:[%s5773_s3 + $0x138] sm:$0xff]   ;;  %v2161_v29 = vrot.slane %v5340_v43, 2  ;;  %v2607_v34 = vpack.c.bf16 %v2147_v36, %v5390_v32  ;;  %v4569_v36 = vld [vmem:[%s5773_s3 + $0x190] sm:$0xff]  }
 0x18f   : > { %4240 = vmatprep.subr.bf16.mxu1 %v4531_v18  ;;  %4266 = vmatprep.subr.bf16.mxu0 %v4532_v26  ;;  %v2159_v42 = vsel %vm2138_vm9, %v2157_v38, %v2158_v60  ;;  %v4550_v32 = vld [vmem:[%s5773_s3 + $0x158] sm:$0xff]   ;;  %v2464_v7 = vpack.c.bf16 %v2459_v30, %v5400_v40  ;;  %v4568_v40 = vld [vmem:[%s5773_s3 + $0x1d0] sm:$0xff]  }
 0x190   : > { %4209 = vmatmul.mubr.bf16.gmra.mxu1 %v5406_v46  ;;  %v5465_v44 = vsel %vm2138_vm9, %v2154_v17, %v2155_v19  ;;  %v4561_v17 = vld [vmem:[%s5773_s3 + $0x1b0] sm:$0xff]   ;;  %v2463_v19 = vpack.c.bf16 %v5397_v37, %v5354_v41  ;;  %v4563_v41 = vld [vmem:[%s5773_s3 + $0x1a8] sm:$0xff]   ;;  %v4564_v37 = vld [vmem:[%s5773_s3 + $0x1e0] sm:$0xff]  }
 0x191   : > { %4241 = vmatpush3.bf16.msra.mxu1 %v4531_v18  ;;  %4252 = vmatprep.mubr.bf16.mxu1 %v2171_v55  ;;  %v5481_v16 = vpack.c.bf16 %v5465_v44, %v5474_v57  ;;  %v4546_v18 = vld [vmem:[%s5773_s3 + $0x168] sm:$0xff]   ;;  %v2461_v55 = vpack.c.bf16 %v5315_v63, %v5287_v56  ;;  %v4552_v56 = vld [vmem:[%s5773_s3 + $0x150] sm:$0xff]   ;;  %v2609_v50 = vpack.c.bf16 %v2159_v42, %v5465_v44  ;;  %v4574_v44 = vld [vmem:[%s5773_s3 + $0x238] sm:$0xff]  }
 0x192   : > { %4267 = vmatpush3.bf16.msra.mxu0 %v4532_v26  ;;  %4242 = vmatprep.subr.bf16.mxu1 %v4533_v59  ;;  %v2160_v26 = vrot.slane %v5338_v49, 2  ;;  %v4553_v63 = vld [vmem:[%s5773_s3 + $0x110] sm:$0xff]  }
 0x193   : > { %4268 = vmatprep.subr.bf16.mxu0 %v4534_v20 }
 0x194   : > { %v5503_v43 = vsel %vm2138_vm9, %v2160_v26, %v2161_v29 }
 0x195   : > { %4243 = vmatpush3.bf16.msra.mxu1 %v4533_v59  ;;  %v5506_v49 = vpack.c.bf16 %v5503_v43, %v2159_v42  ;;  %v4549_v59 = vld [vmem:[%s5773_s3 + $0x120] sm:$0xff]   ;;  %v2610_v0 = vpack.c.bf16 %v5416_v3, %v5503_v43 }
 0x196   : > { %4269 = vmatpush3.bf16.msra.mxu0 %v4534_v20  ;;  %4244 = vmatprep.subr.bf16.mxu1 %v4535_v62  ;;  %v4551_v20 = vld [vmem:[%s5773_s3 + $0x118] sm:$0xff]  }
 0x197   : > { %4270 = vmatprep.subr.bf16.mxu0 %v4536_v21 }
 0x199   : > { %4245 = vmatpush3.bf16.msra.mxu1 %v4535_v62  ;;  %v4554_v62 = vld [vmem:[%s5773_s3 + $0x148] sm:$0xff]  }
 0x19a   : > { %4271 = vmatpush3.bf16.msra.mxu0 %v4536_v21  ;;  %4246 = vmatprep.subr.bf16.mxu1 %v4537_v53  ;;  %v4555_v21 = vld [vmem:[%s5773_s3 + $0x108] sm:$0xff]  }
 0x19b   : > { %4272 = vmatprep.subr.bf16.mxu0 %v4538_v15 }
 0x19d   : > { %4247 = vmatpush3.bf16.msra.mxu1 %v4537_v53  ;;  %v4556_v53 = vld [vmem:[%s5773_s3 + $0x140] sm:$0xff]  }
 0x19e   : > { %4273 = vmatpush3.bf16.msra.mxu0 %v4538_v15  ;;  %4248 = vmatprep.subr.bf16.mxu1 %v4539_v6  ;;  %v4557_v15 = vld [vmem:[%s5773_s3 + $0x100] sm:$0xff]  }
 0x19f   : > { %4274 = vmatprep.subr.bf16.mxu0 %v4540_v39 }
 0x1a1   : > { %4249 = vmatpush3.bf16.msra.mxu1 %v4539_v6  ;;  %v4558_v6 = vld [vmem:[%s5773_s3 + $0x1f8] sm:$0xff]  }
 0x1a2   : > { %4275 = vmatpush3.bf16.msra.mxu0 %v4540_v39  ;;  %4250 = vmatprep.subr.bf16.mxu1 %v4541_v5  ;;  %v2608_v39 = vpack.c.bf16 %v5474_v57, %v5468_v47  ;;  %v2891_v47 = vrot.slane %v5311_v28, 1  ;;  %v4575_v57 = vld [vmem:[%s5773_s3 + $0x230] sm:$0xff]   ;;  %v4576_v28 = vld [vmem:[%s5773_s3 + $0x228] sm:$0xff]  }
 0x1a3   : > { %4308 = vmatprep.subr.bf16.mxu0 %v4542_v51 }
 0x1a5   : > { %4251 = vmatpush3.bf16.msra.mxu1 %v4541_v5  ;;  %4277 = vmatmul.mubr.bf16.vlgmr.msra.gmra.mxu0 %v2314_v45  ;;  %v4559_v5 = vld [vmem:[%s5773_s3 + $0x1b8] sm:$0xff]  }
 0x1a6   : > { %4280 = vmatprep.mubr.bf16.mxu0 %v2315_v33  ;;  %4309 = vmatpush3.bf16.msra.mxu0 %v4542_v51  ;;  %v4560_v51 = vld [vmem:[%s5773_s3 + $0x1f0] sm:$0xff]   ;;  %v4566_v45 = vld [vmem:[%s5773_s3 + $0x1d8] sm:$0xff]   ;;  %v4573_v33 = vld [vmem:[%s5773_s3 + $0x180] sm:$0xff]  }
 0x1a7   : > { %4284 = vmatprep.subr.bf16.mxu1 %v4543_v24  ;;  %4310 = vmatprep.subr.bf16.mxu0 %v4544_v1 }
 0x1a8   : > { %4253 = vmatmul.mubr.bf16.vlgmr.msra.gmra.mxu1 %v5471_v48 }
 0x1a9   : > { %4256 = vmatprep.mubr.bf16.mxu1 %v5481_v16  ;;  %4285 = vmatpush3.bf16.msra.mxu1 %v4543_v24  ;;  %v4571_v24 = vld [vmem:[%s5773_s3 + $0x188] sm:$0xff]  }
 0x1aa   : > { %4311 = vmatpush3.bf16.msra.mxu0 %v4544_v1  ;;  %4286 = vmatprep.subr.bf16.mxu1 %v4545_v11  ;;  %v4572_v1 = vld [vmem:[%s5773_s3 + $0x1c0] sm:$0xff]  }
 0x1ab   : > { %4312 = vmatprep.subr.bf16.mxu0 %v4546_v18 }
 0x1ad   : > { %4281 = vmatmul.mubr.bf16.gmra.mxu0 %v2316_v31  ;;  %4287 = vmatpush3.bf16.msra.mxu1 %v4545_v11  ;;  %v2892_v11 = vsel %vm614_vm0, %v5266_v4, %v2891_v47  ;;  %v4578_v4 = vld [vmem:[%s5773_s3 + $0x218] sm:$0xff]   ;;  %v4584_v47 = vld [vmem:[%s4671_s20 + $0xe8] sm:$0xf] }
 0x1ae   : > { %4313 = vmatpush3.bf16.msra.mxu0 %v4546_v18  ;;  %4324 = vmatprep.mubr.bf16.mxu0 %v2607_v34 }
 0x1af   : > { %4288 = vmatprep.subr.bf16.mxu1 %v4547_v12  ;;  %4314 = vmatprep.subr.bf16.mxu0 %v4548_v22 }
 0x1b0   : > { %4257 = vmatmul.mubr.bf16.gmra.mxu1 %v5506_v49 }
 0x1b1   : > { %4289 = vmatpush3.bf16.msra.mxu1 %v4547_v12  ;;  %4300 = vmatprep.mubr.bf16.mxu1 %v2461_v55 }
 0x1b2   : > { %4315 = vmatpush3.bf16.msra.mxu0 %v4548_v22  ;;  %4290 = vmatprep.subr.bf16.mxu1 %v4549_v59 }
 0x1b3   : > { %4316 = vmatprep.subr.bf16.mxu0 %v4550_v32 }
 0x1b5   : > { %4291 = vmatpush3.bf16.msra.mxu1 %v4549_v59 }
 0x1b6   : > { %4317 = vmatpush3.bf16.msra.mxu0 %v4550_v32  ;;  %4292 = vmatprep.subr.bf16.mxu1 %v4551_v20 }
 0x1b7   : > { %4318 = vmatprep.subr.bf16.mxu0 %v4552_v56 }
 0x1b9   : > { %4293 = vmatpush3.bf16.msra.mxu1 %v4551_v20 }
 0x1ba   : > { %4319 = vmatpush3.bf16.msra.mxu0 %v4552_v56  ;;  %4294 = vmatprep.subr.bf16.mxu1 %v4553_v63 }
 0x1bb   : > { %4320 = vmatprep.subr.bf16.mxu0 %v4554_v62 }
 0x1bd   : > { %4295 = vmatpush3.bf16.msra.mxu1 %v4553_v63 }
 0x1be   : > { %4321 = vmatpush3.bf16.msra.mxu0 %v4554_v62  ;;  %4296 = vmatprep.subr.bf16.mxu1 %v4555_v21 }
 0x1bf   : > { %4322 = vmatprep.subr.bf16.mxu0 %v4556_v53 }
 0x1c1   : > { %4297 = vmatpush3.bf16.msra.mxu1 %v4555_v21 }
 0x1c2   : > { %4323 = vmatpush3.bf16.msra.mxu0 %v4556_v53  ;;  %4298 = vmatprep.subr.bf16.mxu1 %v4557_v15 }
 0x1c3   : > { %4356 = vmatprep.subr.bf16.mxu0 %v4558_v6 }
 0x1c5   : > { %4299 = vmatpush3.bf16.msra.mxu1 %v4557_v15  ;;  %4325 = vmatmul.mubr.bf16.vlgmr.msra.gmra.mxu0 %v2608_v39 }
 0x1c6   : > { %4328 = vmatprep.mubr.bf16.mxu0 %v2609_v50  ;;  %4357 = vmatpush3.bf16.msra.mxu0 %v4558_v6 }
 0x1c7   : > { %4332 = vmatprep.subr.bf16.mxu1 %v4559_v5  ;;  %4358 = vmatprep.subr.bf16.mxu0 %v4560_v51 }
 0x1c8   : > { %4301 = vmatmul.mubr.bf16.vlgmr.msra.gmra.mxu1 %v2462_v54 }
 0x1c9   : > { %4304 = vmatprep.mubr.bf16.mxu1 %v2463_v19  ;;  %4333 = vmatpush3.bf16.msra.mxu1 %v4559_v5 }
 0x1ca   : > { %4359 = vmatpush3.bf16.msra.mxu0 %v4560_v51  ;;  %4334 = vmatprep.subr.bf16.mxu1 %v4561_v17 }
 0x1cb   : > { %4360 = vmatprep.subr.bf16.mxu0 %v4562_v23 }
 0x1cd   : > { %4329 = vmatmul.mubr.bf16.gmra.mxu0 %v2610_v0  ;;  %4335 = vmatpush3.bf16.msra.mxu1 %v4561_v17 }
 0x1ce   : > { %4361 = vmatpush3.bf16.msra.mxu0 %v4562_v23  ;;  %4372 = vmatprep.mubr.bf16.mxu0 %v5327_v13  ;;  %v4567_v13 = vld [vmem:[%s5773_s3 + $0x198] sm:$0xff]  }
 0x1cf   : > { %4336 = vmatprep.subr.bf16.mxu1 %v4563_v41  ;;  %4362 = vmatprep.subr.bf16.mxu0 %v4564_v37 }
 0x1d0   : > { %4305 = vmatmul.mubr.bf16.gmra.mxu1 %v2464_v7 }
 0x1d1   : > { %4337 = vmatpush3.bf16.msra.mxu1 %v4563_v41  ;;  %4348 = vmatprep.mubr.bf16.mxu1 %v5302_v52  ;;  %v4570_v52 = vld [vmem:[%s5773_s3 + $0x1c8] sm:$0xff]  }
 0x1d2   : > { %4363 = vmatpush3.bf16.msra.mxu0 %v4564_v37  ;;  %4338 = vmatprep.subr.bf16.mxu1 %v4565_v25 }
 0x1d3   : > { %4364 = vmatprep.subr.bf16.mxu0 %v4566_v45 }
 0x1d5   : > { %4339 = vmatpush3.bf16.msra.mxu1 %v4565_v25 }
 0x1d6   : > { %4365 = vmatpush3.bf16.msra.mxu0 %v4566_v45  ;;  %4340 = vmatprep.subr.bf16.mxu1 %v4567_v13 }
 0x1d7   : > { %4366 = vmatprep.subr.bf16.mxu0 %v4568_v40 }
 0x1d9   : > { %4341 = vmatpush3.bf16.msra.mxu1 %v4567_v13 }
 0x1da   : > { %4367 = vmatpush3.bf16.msra.mxu0 %v4568_v40  ;;  %4342 = vmatprep.subr.bf16.mxu1 %v4569_v36 }
 0x1db   : > { %4368 = vmatprep.subr.bf16.mxu0 %v4570_v52 }
 0x1dd   : > { %4343 = vmatpush3.bf16.msra.mxu1 %v4569_v36 }
 0x1de   : > { %4369 = vmatpush3.bf16.msra.mxu0 %v4570_v52  ;;  %4344 = vmatprep.subr.bf16.mxu1 %v4571_v24 }
 0x1df   : > { %4370 = vmatprep.subr.bf16.mxu0 %v4572_v1 }
 0x1e1   : > { %4345 = vmatpush3.bf16.msra.mxu1 %v4571_v24 }
 0x1e2   : > { %4371 = vmatpush3.bf16.msra.mxu0 %v4572_v1  ;;  %4346 = vmatprep.subr.bf16.mxu1 %v4573_v33 }
 0x1e5   : > { %4347 = vmatpush3.bf16.msra.mxu1 %v4573_v33  ;;  %4373 = vmatmul.mubr.bf16.vlgmr.msra.gmra.mxu0 %v5361_v35  ;;  %v2894_v35 = vpack.c.bf16 %v2892_v11, %v2459_v30 }
 0x1e6   : > { %4376 = vmatprep.mubr.bf16.mxu0 %v5406_v46  ;;  %4380 = vmatprep.subr.bf16.mxu1 %v4574_v44  ;;  %v2749_v46 = vpack.c.bf16 %v5816_v9, %v5365_v8  ;;  %v4579_v9 = vld [vmem:[%s5773_s3 + $0x210] sm:$0xff]   ;;  %v4580_v8 = vld [vmem:[%s5773_s3 + $0x208] sm:$0xff]  }
 0x1e8   : > { %4349 = vmatmul.mubr.bf16.vlgmr.msra.gmra.mxu1 %v5331_v61  ;;  %v4577_v61 = vld [vmem:[%s5773_s3 + $0x220] sm:$0xff]  }
 0x1e9   : > { %4352 = vmatprep.mubr.bf16.mxu1 %v5376_v27  ;;  %4381 = vmatpush3.bf16.msra.mxu1 %v4574_v44  ;;  %v4581_v27 = vld [vmem:[%s5773_s3 + $0x200] sm:$0xff]  }
 0x1ea   : > { %4382 = vmatprep.subr.bf16.mxu1 %v4575_v57 }
 0x1ed   : > { %4377 = vmatmul.mubr.bf16.gmra.mxu0 %v2894_v35  ;;  %4383 = vmatpush3.bf16.msra.mxu1 %v4575_v57  ;;  %v325_v57 = vunpack.c.l.bf16 %v4584_v47 }
 0x1ee   : > { %4384 = vmatprep.subr.bf16.mxu1 %v4576_v28 }
 0x1f0   : > { %4353 = vmatmul.mubr.bf16.gmra.mxu1 %v2749_v46 }
 0x1f1   : > { %4385 = vmatpush3.bf16.msra.mxu1 %v4576_v28  ;;  %4396 = vmatprep.mubr.bf16.mxu1 %v5471_v48 }
 0x1f2   : > { %4386 = vmatprep.subr.bf16.mxu1 %v4577_v61 }
 0x1f5   : > { %4387 = vmatpush3.bf16.msra.mxu1 %v4577_v61 }
 0x1f6   : > { %4388 = vmatprep.subr.bf16.mxu1 %v4578_v4 }
 0x1f9   : > { %4389 = vmatpush3.bf16.msra.mxu1 %v4578_v4  ;;  %v4585_v4 = vld [vmem:[%s4671_s20 + $0x60] sm:$0xf] }
 0x1fa   : > { %4390 = vmatprep.subr.bf16.mxu1 %v4579_v9 }
 0x1fd   : > { %4391 = vmatpush3.bf16.msra.mxu1 %v4579_v9  ;;  %v275_v9 = vunpack.c.l.bf16 %v4585_v4 }
 0x1fe   : > { %4392 = vmatprep.subr.bf16.mxu1 %v4580_v8 }
 0x201   : > { %4393 = vmatpush3.bf16.msra.mxu1 %v4580_v8 }
 0x202   : > { %4394 = vmatprep.subr.bf16.mxu1 %v4581_v27 }
 0x205   : > { %4395 = vmatpush3.bf16.msra.mxu1 %v4581_v27  ;;  %v5824_v27 = vld [vmem:[#allocation15_spill] sm:$0xff] }
 0x208   : > { %4397 = vmatmul.mubr.bf16.vlgmr.msra.gmra.mxu1 %v5481_v16 }
 0x209   : > { %4400 = vmatprep.mubr.bf16.mxu1 %v5506_v49 }
 0x210   : > { %4401 = vmatmul.mubr.bf16.gmra.mxu1 %v3037_v14 }
 0x245   : > { %v4230_v26 = vpop.f32.mrf.mxu0 }
 0x247   : > { %v2107_v31 = vpop.f32.mrf.mxu0 }
 0x248   : > { %v4206_v48 = vpop.f32.mrf.mxu1 }
 0x249   : > { %v4231_v12 = vpop.f32.mrf.mxu0  ;;  %v2116_v1 = vadd.f32 %v4230_v26, %v4206_v48 }
 0x24a   : > { %v1994_v18 = vpop.f32.mrf.mxu1 }
 0x24b   : > { %v2110_v16 = vpop.f32.mrf.mxu0  ;;  %v2108_v11 = vadd.f32 %v2107_v31, %v1994_v18 }
 0x24c   : > { %v4207_v38 = vpop.f32.mrf.mxu1 }
 0x24d   : > { %v4234_v43 = vpop.f32.mrf.mxu0  ;;  %v2119_v46 = vadd.f32 %v4231_v12, %v4207_v38 }
 0x24e   : > { %v5640_v60 = vpop.f32.mrf.mxu1 }
 0x24f   : > { %v2123_v3 = vpop.f32.mrf.mxu0 }
 0x250   : > { %v5642_v29 = vpop.f32.mrf.mxu1 }
 0x251   : > { %v5650_v49 = vpop.f32.mrf.mxu0  ;;  %v2132_v31 = vadd.f32 %v4234_v43, %v5642_v29 }
 0x252   : > { %v5644_v42 = vpop.f32.mrf.mxu1 }
 0x253   : > { %v5652_v55 = vpop.f32.mrf.mxu0  ;;  %v2124_v38 = vadd.f32 %v2123_v3, %v5644_v42 }
 0x254   : > { %v5646_v22 = vpop.f32.mrf.mxu1 }
 0x256   : > { %v5648_v34 = vpop.f32.mrf.mxu1 }
 0x257   : > { %v2127_v29 = vadd.f32 %v5652_v55, %v5648_v34 }
 0x265   : > { %v4278_v20 = vpop.f32.mrf.mxu0 }
 0x267   : > { %v2416_v63 = vpop.f32.mrf.mxu0 }
 0x268   : > { %v4254_v58 = vpop.f32.mrf.mxu1 }
 0x269   : > { %v4279_v21 = vpop.f32.mrf.mxu0  ;;  %v2307_v28 = vadd.f32 %v4254_v58, %v2116_v1  ;;  %v4587_v1 = vld [vmem:[%s4671_s20 + $0x68] sm:$0xf] }
 0x26a   : > { %v2274_v14 = vpop.f32.mrf.mxu1 }
 0x26b   : > { %v5656_v15 = vpop.f32.mrf.mxu0  ;;  %v2305_v61 = vadd.f32 %v2274_v14, %v2108_v11  ;;  %v2449_v26 = vadd.f32 %v4278_v20, %v2307_v28  ;;  %v276_v11 = vunpack.c.l.bf16 %v4587_v1 }
 0x26c   : > { %v4255_v59 = vpop.f32.mrf.mxu1 }
 0x26d   : > { %v5660_v39 = vpop.f32.mrf.mxu0  ;;  %v2308_v48 = vadd.f32 %v4255_v59, %v2119_v46  ;;  %v2447_v18 = vadd.f32 %v2416_v63, %v2305_v61  ;;  %v5825_v59 = vld [vmem:[#allocation16_spill] sm:$0xff] }
 0x26e   : > { %v2277_v32 = vpop.f32.mrf.mxu1 }
 0x26f   : > { %v5662_v51 = vpop.f32.mrf.mxu0 }
 0x270   : > { %v4258_v56 = vpop.f32.mrf.mxu1 }
 0x271   : > { %v5664_v54 = vpop.f32.mrf.mxu0 }
 0x272   : > { %v2290_v62 = vpop.f32.mrf.mxu1 }
 0x273   : > { %v5666_v19 = vpop.f32.mrf.mxu0 }
 0x274   : > { %v5654_v53 = vpop.f32.mrf.mxu1 }
 0x276   : > { %v5658_v6 = vpop.f32.mrf.mxu1 }
 0x285   : > { %v4326_v10 = vpop.f32.mrf.mxu0 }
 0x287   : > { %v2710_v0 = vpop.f32.mrf.mxu0 }
 0x288   : > { %v4302_v5 = vpop.f32.mrf.mxu1 }
 0x289   : > { %v5674_v41 = vpop.f32.mrf.mxu0  ;;  %v2597_v47 = vadd.f32 %v4302_v5, %v2449_v26 }
 0x28a   : > { %v2564_v50 = vpop.f32.mrf.mxu1 }
 0x28b   : > { %v5678_v7 = vpop.f32.mrf.mxu0  ;;  %v2595_v4 = vadd.f32 %v2564_v50, %v2447_v18  ;;  %v2743_v28 = vadd.f32 %v4326_v10, %v2597_v47  ;;  %v5832_v18 = vld [vmem:[#allocation9_spill] sm:$0xff] }
 0x28c   : > { %v4303_v17 = vpop.f32.mrf.mxu1 }
 0x28d   : > { %v5682_v45 = vpop.f32.mrf.mxu0 }
 0x28e   : > { %v5668_v23 = vpop.f32.mrf.mxu1  ;;  %5819 = vst [vmem:[#allocation20_spill] sm:$0xff] %v5682_v45  ;;  %v2111_v45 = vadd.f32 %v2110_v16, %v5640_v60  ;;  %v2311_v60 = vadd.f32 %v4258_v56, %v2132_v31  ;;  %v2309_v16 = vadd.f32 %v2290_v62, %v2124_v38  ;;  %v2310_v56 = vadd.f32 %v5658_v6, %v2127_v29  ;;  %v5833_v31 = vld [vmem:[#allocation14_spill] sm:$0xff]  ;;  %v5834_v38 = vld [vmem:[#allocation7_spill] sm:$0xff] }
 0x28f   : > { %v5684_v40 = vpop.f32.mrf.mxu0 }
 0x290   : > { %v5670_v2 = vpop.f32.mrf.mxu1  ;;  %5820 = vst [vmem:[#allocation21_spill] sm:$0xff] %v5684_v40  ;;  %v4586_v40 = vld [vmem:[%s4671_s20 + $0xf0] sm:$0xf]  ;;  %v2306_v12 = vadd.f32 %v2277_v32, %v2111_v45  ;;  %v2741_v45 = vadd.f32 %v2710_v0, %v2595_v4  ;;  %v2451_v34 = vadd.f32 %v5662_v51, %v2309_v16  ;;  %v2452_v51 = vadd.f32 %v5666_v19, %v2310_v56  ;;  %v5835_v19 = vld [vmem:[#allocation12_spill] sm:$0xff] }
 0x291   : > { %v5686_v52 = vpop.f32.mrf.mxu0  ;;  %v5826_v32 = vld [vmem:[#allocation5_spill] sm:$0xff] }
 0x292   : > { %v5672_v30 = vpop.f32.mrf.mxu1  ;;  %5821 = vst [vmem:[#allocation22_spill] sm:$0xff] %v5686_v52  ;;  %v1773_v52 = vadd.f32 %v5824_v27, %v325_v57  ;;  %v2450_v57 = vadd.f32 %v4279_v21, %v2308_v48  ;;  %v2448_v43 = vadd.f32 %v5656_v15, %v2306_v12  ;;  %v1791_v12 = vadd.f32 %v5835_v19, %v5834_v38 }
 0x293   : > { %v5688_v33 = vpop.f32.mrf.mxu0  ;;  %v2599_v0 = vadd.f32 %v5672_v30, %v2451_v34  ;;  %v5831_v30 = vld [vmem:[#allocation11_spill] sm:$0xff] }
 0x294   : > { %v5676_v37 = vpop.f32.mrf.mxu1  ;;  %5822 = vst [vmem:[#allocation23_spill] sm:$0xff] %v5688_v33  ;;  %v326_v33 = vunpack.c.l.bf16 %v4586_v40  ;;  %v1781_v14 = vadd.f32 %v1773_v52, %v275_v9  ;;  %v2135_v40 = vadd.f32 %v5650_v49, %v5646_v22  ;;  %v2598_v63 = vadd.f32 %v4303_v17, %v2450_v57  ;;  %v5827_v52 = vld [vmem:[#allocation3_spill] sm:$0xff] }
 0x295   : > { %v2596_v62 = vadd.f32 %v5668_v23, %v2448_v43  ;;  %v2453_v17 = vadd.f32 %v5660_v39, %v2311_v60  ;;  %v5829_v23 = vld [vmem:[#allocation6_spill] sm:$0xff] }
 0x296   : > { %v5680_v25 = vpop.f32.mrf.mxu1  ;;  %v1774_v20 = vadd.f32 %v5825_v59, %v326_v33  ;;  %v2312_v42 = vadd.f32 %v5654_v53, %v2135_v40  ;;  %v1789_v21 = vadd.f32 %v1781_v14, %v5826_v32  ;;  %v5828_v33 = vld [vmem:[#allocation10_spill] sm:$0xff]  ;;  %v2744_v15 = vadd.f32 %v5674_v41, %v2598_v63 }
 0x297   : > { %v1787_v22 = vadd.f32 %v5828_v33, %v5827_v52  ;;  %v2601_v10 = vadd.f32 %v5670_v2, %v2453_v17  ;;  %v2742_v41 = vadd.f32 %v5678_v7, %v2596_v62  ;;  %v5727_v2 = vld [vmem:[%s5774_s4] ss:$0 sm:$0xff]  ;;  %v2600_v7 = vadd.f32 %v5680_v25, %v2452_v51  ;;  %v5838_v57 = vld [vmem:[#allocation21_spill] sm:$0xff] }
 0x298   : > { %v1782_v49 = vadd.f32 %v1774_v20, %v276_v11  ;;  %v1797_v61 = vmul.f32 0.25, %v1789_v21  ;;  %v5837_v11 = vld [vmem:[#allocation20_spill] sm:$0xff]  ;;  %v2745_v59 = vadd.f32 %v5838_v57, %v2599_v0 }
 0x299   : > { %v1795_v27 = vmul.f32 0.25, %v1787_v22  ;;  %v2747_v4 = vadd.f32 %v5837_v11, %v2601_v10 }
 0x29a   : > { %v1790_v48 = vadd.f32 %v1782_v49, %v5829_v23 }
 0x29b   : > { %v5840_v22 = vld [vmem:[#allocation23_spill] sm:$0xff] }
 0x29c   : > { %v2746_v49 = vadd.f32 %v5840_v22, %v2600_v7 }
 0x2a5   : > { %v4374_v35 = vpop.f32.mrf.mxu0 }
 0x2a8   : > { %v4350_v13 = vpop.f32.mrf.mxu1 }
 0x2a9   : > { %v2882_v50 = vadd.f32 %v4350_v13, %v2743_v28  ;;  %v2454_v13 = vadd.f32 %v5664_v54, %v2312_v42  ;;  %v5830_v54 = vld [vmem:[#allocation4_spill] sm:$0xff]  ;;  %v5839_v42 = vld [vmem:[#allocation22_spill] sm:$0xff] }
 0x2aa   : > { %v2849_v36 = vpop.f32.mrf.mxu1 }
 0x2ab   : > { %v2880_v53 = vadd.f32 %v2849_v36, %v2741_v45  ;;  %v3027_v6 = vadd.f32 %v4374_v35, %v2882_v50  ;;  %v2602_v39 = vadd.f32 %v5676_v37, %v2454_v13  ;;  %v1793_v37 = vadd.f32 %v5833_v31, %v5832_v18 }
 0x2ac   : > { %v4351_v24 = vpop.f32.mrf.mxu1 }
 0x2ad   : > { %v2883_v9 = vadd.f32 %v4351_v24, %v2744_v15  ;;  %v1788_v24 = vadd.f32 %v5831_v30, %v5830_v54  ;;  %v2748_v43 = vadd.f32 %v5839_v42, %v2602_v39  ;;  %v1801_v52 = vmul.f32 0.25, %v1793_v37  ;;  %v5842_v39 = vld [vmem:[#allocation13_spill] sm:$0xff] }
 0x2ae   : > { %v5690_v44 = vpop.f32.mrf.mxu1 }
 0x2af   : > { %5823 = vst [vmem:[#allocation24_spill] sm:$0xff] %v5690_v44  ;;  %v2994_v44 = vpop.f32.mrf.mxu0  ;;  %v1796_v32 = vmul.f32 0.25, %v1788_v24  ;;  %v5843_v24 = vld [vmem:[#allocation17_spill] sm:$0xff] }
 0x2b0   : > { %v5694_v8 = vpop.f32.mrf.mxu1  ;;  %v3025_v47 = vadd.f32 %v2994_v44, %v2880_v53  ;;  %v1798_v44 = vmul.f32 0.25, %v1790_v48 }
 0x2b1   : > { %v4375_v5 = vpop.f32.mrf.mxu0  ;;  %v2886_v28 = vadd.f32 %v5694_v8, %v2747_v4 }
 0x2b2   : > { %v2865_v58 = vpop.f32.mrf.mxu1  ;;  %v3028_v16 = vadd.f32 %v4375_v5, %v2883_v9  ;;  %v1799_v5 = vmul.f32 0.25, %v1791_v12 }
 0x2b3   : > { %v2997_v55 = vpop.f32.mrf.mxu0  ;;  %v2884_v29 = vadd.f32 %v2865_v58, %v2745_v59 }
 0x2b4   : > { %v4355_v3 = vpop.f32.mrf.mxu1 }
 0x2b5   : > { %v4378_v36 = vpop.f32.mrf.mxu0  ;;  %v2887_v33 = vadd.f32 %v4355_v3, %v2748_v43 }
 0x2b6   : > { %v2868_v46 = vpop.f32.mrf.mxu1  ;;  %v5836_v14 = vld [vmem:[#allocation24_spill] sm:$0xff]  ;;  %v3031_v3 = vadd.f32 %v4378_v36, %v2886_v28 }
 0x2b7   : > { %v2881_v1 = vadd.f32 %v5836_v14, %v2742_v41  ;;  %v3010_v63 = vpop.f32.mrf.mxu0  ;;  %v2885_v53 = vadd.f32 %v2868_v46, %v2746_v49 }
 0x2b8   : > { %v3029_v0 = vadd.f32 %v3010_v63, %v2884_v29 }
 0x2b9   : > { %v3026_v56 = vadd.f32 %v2997_v55, %v2881_v1  ;;  %v4379_v34 = vpop.f32.mrf.mxu0 }
 0x2ba   : > { %v3032_v48 = vadd.f32 %v4379_v34, %v2887_v33 }
 0x2c8   : > { %v4398_v26 = vpop.f32.mrf.mxu1 }
 0x2c9   : > { %v3170_v35 = vadd.f32 %v4398_v26, %v3027_v6  ;;  %v3013_v26 = vpop.f32.mrf.mxu0 }
 0x2ca   : > { %v3137_v20 = vpop.f32.mrf.mxu1  ;;  %v3030_v38 = vadd.f32 %v3013_v26, %v2885_v53 }
 0x2cb   : > { %v3185_v40 = vadd.f32 %v5727_v2, %v3170_v35  ;;  %v3168_v60 = vadd.f32 %v3137_v20, %v3025_v47  ;;  %v1802_v35 = vmul.f32 0.25, %v5843_v24 }
 0x2cc   : > { %v4399_v25 = vpop.f32.mrf.mxu1 }
 0x2cd   : > { %v3193_v21 = vadd.f32 %v3185_v40, %v1797_v61  ;;  %v3183_v50 = vadd.f32 %v5727_v2, %v3168_v60  ;;  %v3171_v45 = vadd.f32 %v4399_v25, %v3028_v16 }
 0x2ce   : > { %v3140_v62 = vpop.f32.mrf.mxu1 }
 0x2cf   : > { %vm3201_vm10 = vcmp.gt.f32.partialorder %v3193_v21, 0.0  ;;  %v3209_v8 = vmul.f32 0.01, %v3193_v21  ;;  %v3191_v58 = vadd.f32 %v3183_v50, %v1795_v27  ;;  %v3186_v17 = vadd.f32 %v5727_v2, %v3171_v45  ;;  %v5841_v27 = vld [vmem:[#allocation8_spill] sm:$0xff] }
 0x2d0   : > { %v3169_v15 = vadd.f32 %v3140_v62, %v3026_v56  ;;  %v4402_v10 = vpop.f32.mrf.mxu1  ;;  %v1792_v51 = vadd.f32 %v5842_v39, %v5841_v27 }
 0x2d1   : > { %v3217_v55 = vsel %vm3201_vm10, %v3193_v21, %v3209_v8  ;;  %vm3199_vm11 = vcmp.gt.f32.partialorder %v3191_v58, 0.0  ;;  %v3207_v13 = vmul.f32 0.01, %v3191_v58  ;;  %v3194_v61 = vadd.f32 %v3186_v17, %v1798_v44 }
 0x2d2   : > { %3225 = vst [vmem:[%s5748_s6 + $0x10] sm:$0xff] %v3217_v55  ;;  %v3184_v9 = vadd.f32 %v5727_v2, %v3169_v15  ;;  %v3174_v6 = vadd.f32 %v4402_v10, %v3031_v3  ;;  %v3153_v23 = vpop.f32.mrf.mxu1  ;;  %v1800_v11 = vmul.f32 0.25, %v1792_v51 }
 0x2d3   : > { %v3215_v46 = vsel %vm3199_vm11, %v3191_v58, %v3207_v13  ;;  %vm3202_vm12 = vcmp.gt.f32.partialorder %v3194_v61, 0.0  ;;  %v3210_v36 = vmul.f32 0.01, %v3194_v61  ;;  %v3172_v41 = vadd.f32 %v3153_v23, %v3029_v0 }
 0x2d4   : > { %3223 = vst [vmem:[%s5748_s6] sm:$0xff] %v3215_v46  ;;  %v3192_v54 = vadd.f32 %v3184_v9, %v1796_v32  ;;  %v3189_v30 = vadd.f32 %v5727_v2, %v3174_v6  ;;  %v4403_v47 = vpop.f32.mrf.mxu1 }
 0x2d5   : > { %v3218_v18 = vsel %vm3202_vm12, %v3194_v61, %v3210_v36  ;;  %v3187_v31 = vadd.f32 %v5727_v2, %v3172_v41  ;;  %v3175_v37 = vadd.f32 %v4403_v47, %v3032_v48 }
 0x2d6   : > { %3226 = vst [vmem:[%s5748_s6 + $0x18] sm:$0xff] %v3218_v18  ;;  %vm3200_vm13 = vcmp.gt.f32.partialorder %v3192_v54, 0.0  ;;  %v3208_v19 = vmul.f32 0.01, %v3192_v54  ;;  %v3197_v12 = vadd.f32 %v3189_v30, %v1801_v52  ;;  %v3156_v7 = vpop.f32.mrf.mxu1 }
 0x2d7   : > { %v3195_v14 = vadd.f32 %v3187_v31, %v1799_v5  ;;  %v3190_v1 = vadd.f32 %v5727_v2, %v3175_v37  ;;  %v3173_v4 = vadd.f32 %v3156_v7, %v3030_v38 }
 0x2d8   : > { %v3216_v57 = vsel %vm3200_vm13, %v3192_v54, %v3208_v19  ;;  %vm3205_vm14 = vcmp.gt.f32.partialorder %v3197_v12, 0.0  ;;  %v3213_v59 = vmul.f32 0.01, %v3197_v12 }
 0x2d9   : > { %3224 = vst [vmem:[%s5748_s6 + $0x8] sm:$0xff] %v3216_v57  ;;  %vm3203_vm15 = vcmp.gt.f32.partialorder %v3195_v14, 0.0  ;;  %v3211_v20 = vmul.f32 0.01, %v3195_v14  ;;  %v3198_v40 = vadd.f32 %v3190_v1, %v1802_v35  ;;  %v3188_v60 = vadd.f32 %v5727_v2, %v3173_v4 }
 0x2da   : > { %v3221_v44 = vsel %vm3205_vm14, %v3197_v12, %v3213_v59 }
 0x2db   : > { %3229 = vst [vmem:[%s5748_s6 + $0x30] sm:$0xff] %v3221_v44  ;;  %v3219_v16 = vsel %vm3203_vm15, %v3195_v14, %v3211_v20  ;;  %vm3206_vm0 = vcmp.gt.f32.partialorder %v3198_v40, 0.0  ;;  %v3214_v63 = vmul.f32 0.01, %v3198_v40  ;;  %v3196_v28 = vadd.f32 %v3188_v60, %v1800_v11 }
 0x2dc   : > { %3227 = vst [vmem:[%s5748_s6 + $0x20] sm:$0xff] %v3219_v16 }
 0x2dd   : > { %v3222_v29 = vsel %vm3206_vm0, %v3198_v40, %v3214_v63  ;;  %vm3204_vm1 = vcmp.gt.f32.partialorder %v3196_v28, 0.0  ;;  %v3212_v42 = vmul.f32 0.01, %v3196_v28 }
 0x2de   : > { %3230 = vst [vmem:[%s5748_s6 + $0x38] sm:$0xff] %v3222_v29 }
 0x2df   : > { %v3220_v43 = vsel %vm3204_vm1, %v3196_v28, %v3212_v42 }
 0x2e0   : > { %3228 = vst [vmem:[%s5748_s6 + $0x28] sm:$0xff] %v3220_v43 }
 0x2e1 PF: > { %s15_s18 = sadd.s32 1, %s4594_s18  }
 0x2e2   : > { %p12_p4 = scmp.ge.s32.totalorder %s15_s18, 4  }
 0x2e4   :  { %14 = sbr.rel (!%p12_p4) target bundleno = 1 (0x1), region = 90 }

</bundles_post_ra>
